<compile_context>
chip_gen: v5e
topology: v5e:2x2
jax: 0.10.0
libtpu: 0.0.40
codegen_flags: <defaults>
</compile_context>

<pallas_src>
import functools
import math

import jax
import jax.numpy as jnp
from jax import lax
from jax.experimental import pallas as pl
from jax.experimental.pallas import tpu as pltpu


def _loss_kernel(x_ref, emb_ref, pos_ref, neg_ref, pad_emb_ref, padmask_ref,
                 kld_ref, trip_ref, m_sc, l_sc, s_sc, *,
                 vocab_size, fill_val, confidence, const_bias, margin):
    i = pl.program_id(0)            # batch-tile index
    j = pl.program_id(1)            # vocab-tile index (reduction axis, innermost)
    nv = pl.num_programs(1)

    # Zero the grid-resident scalar accumulators once.
    @pl.when(jnp.logical_and(i == 0, j == 0))
    def _():
        kld_ref[...] = jnp.zeros_like(kld_ref)
        trip_ref[...] = jnp.zeros_like(trip_ref)

    # Reset the per-batch-tile online-softmax state at the first vocab tile.
    @pl.when(j == 0)
    def _():
        m_sc[...] = jnp.full_like(m_sc, -jnp.inf)
        l_sc[...] = jnp.zeros_like(l_sc)
        s_sc[...] = jnp.zeros_like(s_sc)

    # logits tile: contract D-with-D directly (no emb.T), f32 accumulation.
    logits = lax.dot_general(
        x_ref[...], emb_ref[...],
        dimension_numbers=(((1,), (1,)), ((), ())),
        preferred_element_type=jnp.float32)                       # (TB, TV)

    # Online log-sum-exp + running sum of logits.
    m_prev = m_sc[...]
    m_new = jnp.maximum(m_prev, jnp.max(logits, axis=-1, keepdims=True))
    corr = jnp.exp(m_prev - m_new)
    l_sc[...] = corr * l_sc[...] + jnp.sum(jnp.exp(logits - m_new),
                                           axis=-1, keepdims=True)
    s_sc[...] = s_sc[...] + jnp.sum(logits, axis=-1, keepdims=True)
    m_sc[...] = m_new

    # Finalize this batch tile at the last vocab tile.
    @pl.when(j == nv - 1)
    def _():
        lse = m_sc[...] + jnp.log(l_sc[...])                      # (TB, 1)
        sum_smx = s_sc[...] - float(vocab_size) * lse             # sum_v log_softmax

        xf = x_ref[...].astype(jnp.float32)
        pos_dot = jnp.sum(xf * pos_ref[...].astype(jnp.float32),
                          axis=-1, keepdims=True)                 # logits[b, tgt[b]]
        neg_dot = jnp.sum(xf * neg_ref[...].astype(jnp.float32),
                          axis=-1, keepdims=True)                 # logits[b, neg[b]]
        pad_dot = jnp.sum(xf * pad_emb_ref[...].astype(jnp.float32),
                          axis=-1, keepdims=True)                 # logits[b, pad_idx]

        smx_tgt = pos_dot - lse
        smx_pad = pad_dot - lse

        keep = 1.0 - padmask_ref[...]                             # 0.0 on pad rows

        # Closed-form smoothed-KLD row sum:
        #   conf*(log conf - smx_tgt)
        #   + fill*((V-2)*log fill - (sum_smx - smx_pad - smx_tgt))
        # with the compile-time constants folded into const_bias.
        kld_row = (const_bias
                   - confidence * smx_tgt
                   - fill_val * (sum_smx - smx_pad - smx_tgt)) * keep

        # TripletLoss (mode='dot'): relu(-(pos - neg + margin)), pad rows zeroed.
        trip_row = jnp.maximum(0.0, -(pos_dot - neg_dot + margin)) * keep

        kld_ref[...] += jnp.sum(kld_row, keepdims=True)
        trip_ref[...] += jnp.sum(trip_row, keepdims=True)


def smooth_kld_and_triplet_loss(x, embeddings, targets, neg_ids, *,
                                pad_idx=0, label_smoothing=0.1,
                                margin=0.0, alpha=1.0,
                                block_b=128, block_v=128):
    B, D = x.shape
    V, D2 = embeddings.shape
    assert D == D2

    block_b = min(block_b, B)
    block_v = min(block_v, V)
    assert B % block_b == 0, "batch size must be divisible by block_b"
    assert V % block_v == 0, "vocab size must be divisible by block_v"
    nb, nv = B // block_b, V // block_v

    fill_val = float(label_smoothing) / (V - 2)
    confidence = 1.0 - float(label_smoothing)
    log_fill = math.log(fill_val) if fill_val > 0.0 else 0.0
    log_conf = math.log(confidence) if confidence > 0.0 else 0.0
    const_bias = confidence * log_conf + fill_val * (V - 2) * log_fill

    targets = targets.astype(jnp.int32)
    neg_ids = neg_ids.astype(jnp.int32)

    # Tiny O(B*D) gathers done in plain JAX so the kernel never scans the
    # (B, V) logits for single columns.
    pos_embs = jnp.take(embeddings, targets, axis=0)                # (B, D)
    neg_embs = jnp.take(embeddings, neg_ids, axis=0)                # (B, D)
    pad_emb = lax.dynamic_slice_in_dim(embeddings, pad_idx, 1, 0)   # (1, D)
    pad_mask = (targets == pad_idx).astype(jnp.float32).reshape(B, 1)

    kernel = functools.partial(
        _loss_kernel,
        vocab_size=V,
        fill_val=fill_val,
        confidence=confidence,
        const_bias=const_bias,
        margin=float(margin),
    )

    grid_spec = pltpu.PrefetchScalarGridSpec(
        num_scalar_prefetch=0,
        grid=(nb, nv),
        in_specs=[
            pl.BlockSpec((block_b, D), lambda i, j: (i, 0)),   # x
            pl.BlockSpec((block_v, D), lambda i, j: (j, 0)),   # embeddings tile
            pl.BlockSpec((block_b, D), lambda i, j: (i, 0)),   # E[targets]
            pl.BlockSpec((block_b, D), lambda i, j: (i, 0)),   # E[neg_ids]
            pl.BlockSpec((1, D), lambda i, j: (0, 0)),         # E[pad_idx]
            pl.BlockSpec((block_b, 1), lambda i, j: (i, 0)),   # pad row mask
        ],
        out_specs=(
            pl.BlockSpec((1, 1), lambda i, j: (0, 0)),         # sum of KLD elems
            pl.BlockSpec((1, 1), lambda i, j: (0, 0)),         # sum of triplet
        ),
        scratch_shapes=[
            pltpu.VMEM((block_b, 1), jnp.float32),  # running max
            pltpu.VMEM((block_b, 1), jnp.float32),  # running sum-exp
            pltpu.VMEM((block_b, 1), jnp.float32),  # running sum of logits
        ],
    )

    kld_sum, trip_sum = pl.pallas_call(
        kernel,
        out_shape=(jax.ShapeDtypeStruct((1, 1), jnp.float32),
                   jax.ShapeDtypeStruct((1, 1), jnp.float32)),
        grid_spec=grid_spec,
        compiler_params=pltpu.CompilerParams(
            # The scalar outputs accumulate across BOTH grid axes, so both
            # must be "arbitrary".
            # TODO(synk): emit per-batch-tile partials and mark the batch axis
            # "parallel" to split work across the two v7x TensorCores.
            dimension_semantics=("arbitrary", "arbitrary"),
            vmem_limit_bytes=32 * 1024 * 1024,
        ),
    )(x, embeddings, pos_embs, neg_embs, pad_emb, pad_mask)

    # Glue: token count and final combine (3 scalar flops).
    tot_toks = jnp.sum(targets != pad_idx).astype(jnp.float32)
    tot_toks = jnp.maximum(tot_toks, 1.0)   # guard all-pad batch (ref would NaN)
    skld = kld_sum[0, 0] / tot_toks
    return skld + alpha * trip_sum[0, 0]


def _reference(x, embeddings, targets, neg_ids, *, pad_idx=0,
               label_smoothing=0.1, margin=0.0, alpha=1.0):
    """Pure-JAX reference mirroring the PyTorch forward."""
    V = embeddings.shape[0]
    B = x.shape[0]
    fill_val = label_smoothing / (V - 2)
    confidence = 1.0 - label_smoothing

    logits = jnp.einsum('bd,vd->bv', x, embeddings)
    smx = jax.nn.log_softmax(logits, axis=-1)

    st = jnp.full((B, V), fill_val, dtype=jnp.float32)
    st = st.at[:, pad_idx].set(0.0)
    st = st.at[jnp.arange(B), targets].set(confidence)
    pad_mask = (targets == pad_idx)
    st = jnp.where(pad_mask[:, None], 0.0, st)
    kld = jnp.where(st > 0, st * (jnp.log(st) - smx), 0.0).sum()
    tot = B - pad_mask.sum()
    skld = kld / tot

    pos = embeddings[targets]
    negs = embeddings[neg_ids]
    pos_dot = jnp.sum(x * pos, axis=-1)
    neg_dot = jnp.sum(x * negs, axis=-1)
    trip = jax.nn.relu(-(pos_dot - neg_dot + margin))
    trip = jnp.where(pad_mask, 0.0, trip)
    return skld + alpha * trip.sum()


if __name__ == "__main__":
    B, D, V = 128, 128, 512   # batch (tokens), embedding dim, vocab size
    pad_idx = 0

    key = jax.random.PRNGKey(0)
    kx, ke, kt, kn = jax.random.split(key, 4)

    x = jax.random.normal(kx, (B, D), dtype=jnp.float32)
    embeddings = jax.random.normal(ke, (V, D), dtype=jnp.float32) * 0.1
    targets = jax.random.randint(kt, (B,), 1, V, dtype=jnp.int32)
    targets = targets.at[:3].set(pad_idx)  # include a few padding tokens
    # random negative sampling (neg_sampling='random'), deterministic seed
    neg_ids = jax.random.randint(kn, (B,), pad_idx + 1, V, dtype=jnp.int32)

    loss = smooth_kld_and_triplet_loss(
        x, embeddings, targets, neg_ids,
        pad_idx=pad_idx, label_smoothing=0.1, margin=0.0, alpha=1.0,
        block_b=128, block_v=128)
    loss = jax.block_until_ready(loss)

    ref = _reference(x, embeddings, targets, neg_ids,
                     pad_idx=pad_idx, label_smoothing=0.1, margin=0.0, alpha=1.0)
    assert jnp.allclose(loss, ref, atol=1e-3, rtol=1e-3), (loss, ref)

    print("KERNEL_OK")
</pallas_src>

<mosaic_0001>
module attributes {stable_mosaic.version = 11 : i64} {
  func.func @_loss_kernel(%arg0: i32, %arg1: i32, %arg2: memref<128x128xf32, #tpu.memory_space<vmem>>, %arg3: memref<128x128xf32, #tpu.memory_space<vmem>>, %arg4: memref<128x128xf32, #tpu.memory_space<vmem>>, %arg5: memref<128x128xf32, #tpu.memory_space<vmem>>, %arg6: memref<1x128xf32, #tpu.memory_space<vmem>>, %arg7: memref<128x1xf32, #tpu.memory_space<vmem>>, %arg8: memref<1x1xf32, #tpu.memory_space<vmem>>, %arg9: memref<1x1xf32, #tpu.memory_space<vmem>>, %arg10: memref<128x1xf32, #tpu.memory_space<vmem>>, %arg11: memref<128x1xf32, #tpu.memory_space<vmem>>, %arg12: memref<128x1xf32, #tpu.memory_space<vmem>>) attributes {dimension_semantics = [#tpu.dimension_semantics<arbitrary>, #tpu.dimension_semantics<arbitrary>], iteration_bounds = array<i64: 1, 4>, scalar_prefetch = 0 : i64, scratch_operands = 3 : i64, tpu.core_type = #tpu.core_type<tc>, window_params = [{transform_indices = @transform_0, window_bounds = array<i64: 128, 128>}, {transform_indices = @transform_1, window_bounds = array<i64: 128, 128>}, {transform_indices = @transform_2, window_bounds = array<i64: 128, 128>}, {transform_indices = @transform_3, window_bounds = array<i64: 128, 128>}, {pipeline_mode = #tpu.pipeline_mode<synchronous>, transform_indices = @transform_4, window_bounds = array<i64: 1, 128>}, {transform_indices = @transform_5, window_bounds = array<i64: 128, 1>}, {pipeline_mode = #tpu.pipeline_mode<synchronous>, transform_indices = @transform_6, window_bounds = array<i64: 1, 1>}, {pipeline_mode = #tpu.pipeline_mode<synchronous>, transform_indices = @transform_7, window_bounds = array<i64: 1, 1>}]} {
    %c0_i32 = arith.constant 0 : i32
    %0 = arith.cmpi eq, %arg0, %c0_i32 : i32
    %c0_i32_0 = arith.constant 0 : i32
    %1 = arith.cmpi eq, %arg1, %c0_i32_0 : i32
    %2 = arith.andi %0, %1 : i1
    %3 = arith.extui %2 : i1 to i32
    %c0_i32_1 = arith.constant 0 : i32
    %4 = arith.cmpi ne, %3, %c0_i32_1 : i32
    scf.if %4 {
      %cst_23 = arith.constant 0.000000e+00 : f32
      %35 = vector.broadcast %cst_23 : f32 to vector<1x1xf32>
      %c0_24 = arith.constant 0 : index
      %c0_25 = arith.constant 0 : index
      %36 = vector.load %arg8[%c0_24, %c0_25] : memref<1x1xf32, #tpu.memory_space<vmem>>, vector<1x1xf32>
      tpu.vector_store %arg8[%c0_24, %c0_25], %35 {strides = array<i32>} : memref<1x1xf32, #tpu.memory_space<vmem>>, vector<1x1xf32>,
      %cst_26 = arith.constant 0.000000e+00 : f32
      %37 = vector.broadcast %cst_26 : f32 to vector<1x1xf32>
      %c0_27 = arith.constant 0 : index
      %c0_28 = arith.constant 0 : index
      %38 = vector.load %arg9[%c0_27, %c0_28] : memref<1x1xf32, #tpu.memory_space<vmem>>, vector<1x1xf32>
      tpu.vector_store %arg9[%c0_27, %c0_28], %37 {strides = array<i32>} : memref<1x1xf32, #tpu.memory_space<vmem>>, vector<1x1xf32>,
    } else {
    }
    %c0_i32_2 = arith.constant 0 : i32
    %5 = arith.cmpi eq, %arg1, %c0_i32_2 : i32
    %6 = arith.extui %5 : i1 to i32
    %c0_i32_3 = arith.constant 0 : i32
    %7 = arith.cmpi ne, %6, %c0_i32_3 : i32
    scf.if %7 {
      %cst_23 = arith.constant 0xFF800000 : f32
      %35 = vector.broadcast %cst_23 : f32 to vector<128x1xf32>
      %c0_24 = arith.constant 0 : index
      %c0_25 = arith.constant 0 : index
      %36 = vector.load %arg10[%c0_24, %c0_25] : memref<128x1xf32, #tpu.memory_space<vmem>>, vector<128x1xf32>
      tpu.vector_store %arg10[%c0_24, %c0_25], %35 {strides = array<i32>} : memref<128x1xf32, #tpu.memory_space<vmem>>, vector<128x1xf32>,
      %cst_26 = arith.constant 0.000000e+00 : f32
      %37 = vector.broadcast %cst_26 : f32 to vector<128x1xf32>
      %c0_27 = arith.constant 0 : index
      %c0_28 = arith.constant 0 : index
      %38 = vector.load %arg11[%c0_27, %c0_28] : memref<128x1xf32, #tpu.memory_space<vmem>>, vector<128x1xf32>
      tpu.vector_store %arg11[%c0_27, %c0_28], %37 {strides = array<i32>} : memref<128x1xf32, #tpu.memory_space<vmem>>, vector<128x1xf32>,
      %cst_29 = arith.constant 0.000000e+00 : f32
      %39 = vector.broadcast %cst_29 : f32 to vector<128x1xf32>
      %c0_30 = arith.constant 0 : index
      %c0_31 = arith.constant 0 : index
      %40 = vector.load %arg12[%c0_30, %c0_31] : memref<128x1xf32, #tpu.memory_space<vmem>>, vector<128x1xf32>
      tpu.vector_store %arg12[%c0_30, %c0_31], %39 {strides = array<i32>} : memref<128x1xf32, #tpu.memory_space<vmem>>, vector<128x1xf32>,
    } else {
    }
    %c0 = arith.constant 0 : index
    %c0_4 = arith.constant 0 : index
    %8 = vector.load %arg2[%c0, %c0_4] : memref<128x128xf32, #tpu.memory_space<vmem>>, vector<128x128xf32>
    %c0_5 = arith.constant 0 : index
    %c0_6 = arith.constant 0 : index
    %9 = vector.load %arg3[%c0_5, %c0_6] : memref<128x128xf32, #tpu.memory_space<vmem>>, vector<128x128xf32>
    %cst = arith.constant dense<0.000000e+00> : vector<128x128xf32>
    %10 = tpu.matmul %8, %9, %cst {dimension_numbers = #tpu.dot_dimension_numbers<[1], [1], [0], [0], [0, 0, 1, 0], [], []>} : vector<128x128xf32>, vector<128x128xf32>, vector<128x128xf32> -> vector<128x128xf32>
    %c0_7 = arith.constant 0 : index
    %c0_8 = arith.constant 0 : index
    %11 = vector.load %arg10[%c0_7, %c0_8] : memref<128x1xf32, #tpu.memory_space<vmem>>, vector<128x1xf32>
    %cst_9 = arith.constant dense<0xFF800000> : vector<128xf32>
    %12 = vector.multi_reduction <maximumf>, %10, %cst_9 [1] : vector<128x128xf32> to vector<128xf32>
    %13 = vector.shape_cast %12 : vector<128xf32> to vector<128x1xf32>
    %14 = arith.maximumf %11, %13 : vector<128x1xf32>
    %15 = arith.subf %11, %14 : vector<128x1xf32>
    %16 = math.exp %15 : vector<128x1xf32>
    %c0_10 = arith.constant 0 : index
    %c0_11 = arith.constant 0 : index
    %17 = vector.load %arg11[%c0_10, %c0_11] : memref<128x1xf32, #tpu.memory_space<vmem>>, vector<128x1xf32>
    %18 = arith.mulf %16, %17 : vector<128x1xf32>
    %19 = vector.broadcast %14 : vector<128x1xf32> to vector<128x128xf32>
    %20 = arith.subf %10, %19 : vector<128x128xf32>
    %21 = math.exp %20 : vector<128x128xf32>
    %cst_12 = arith.constant dense<0.000000e+00> : vector<128xf32>
    %22 = vector.multi_reduction <add>, %21, %cst_12 [1] : vector<128x128xf32> to vector<128xf32>
    %23 = vector.shape_cast %22 : vector<128xf32> to vector<128x1xf32>
    %24 = arith.addf %18, %23 : vector<128x1xf32>
    %c0_13 = arith.constant 0 : index
    %c0_14 = arith.constant 0 : index
    %25 = vector.load %arg11[%c0_13, %c0_14] : memref<128x1xf32, #tpu.memory_space<vmem>>, vector<128x1xf32>
    tpu.vector_store %arg11[%c0_13, %c0_14], %24 {strides = array<i32>} : memref<128x1xf32, #tpu.memory_space<vmem>>, vector<128x1xf32>,
    %c0_15 = arith.constant 0 : index
    %c0_16 = arith.constant 0 : index
    %26 = vector.load %arg12[%c0_15, %c0_16] : memref<128x1xf32, #tpu.memory_space<vmem>>, vector<128x1xf32>
    %cst_17 = arith.constant dense<0.000000e+00> : vector<128xf32>
    %27 = vector.multi_reduction <add>, %10, %cst_17 [1] : vector<128x128xf32> to vector<128xf32>
    %28 = vector.shape_cast %27 : vector<128xf32> to vector<128x1xf32>
    %29 = arith.addf %26, %28 : vector<128x1xf32>
    %c0_18 = arith.constant 0 : index
    %c0_19 = arith.constant 0 : index
    %30 = vector.load %arg12[%c0_18, %c0_19] : memref<128x1xf32, #tpu.memory_space<vmem>>, vector<128x1xf32>
    tpu.vector_store %arg12[%c0_18, %c0_19], %29 {strides = array<i32>} : memref<128x1xf32, #tpu.memory_space<vmem>>, vector<128x1xf32>,
    %c0_20 = arith.constant 0 : index
    %c0_21 = arith.constant 0 : index
    %31 = vector.load %arg10[%c0_20, %c0_21] : memref<128x1xf32, #tpu.memory_space<vmem>>, vector<128x1xf32>
    tpu.vector_store %arg10[%c0_20, %c0_21], %14 {strides = array<i32>} : memref<128x1xf32, #tpu.memory_space<vmem>>, vector<128x1xf32>,
    %c3_i32 = arith.constant 3 : i32
    %32 = arith.cmpi eq, %arg1, %c3_i32 : i32
    %33 = arith.extui %32 : i1 to i32
    %c0_i32_22 = arith.constant 0 : i32
    %34 = arith.cmpi ne, %33, %c0_i32_22 : i32
    scf.if %34 {
      %c0_23 = arith.constant 0 : index
      %c0_24 = arith.constant 0 : index
      %35 = vector.load %arg10[%c0_23, %c0_24] : memref<128x1xf32, #tpu.memory_space<vmem>>, vector<128x1xf32>
      %c0_25 = arith.constant 0 : index
      %c0_26 = arith.constant 0 : index
      %36 = vector.load %arg11[%c0_25, %c0_26] : memref<128x1xf32, #tpu.memory_space<vmem>>, vector<128x1xf32>
      %37 = math.log %36 : vector<128x1xf32>
      %38 = arith.addf %35, %37 : vector<128x1xf32>
      %c0_27 = arith.constant 0 : index
      %c0_28 = arith.constant 0 : index
      %39 = vector.load %arg12[%c0_27, %c0_28] : memref<128x1xf32, #tpu.memory_space<vmem>>, vector<128x1xf32>
      %cst_29 = arith.constant 5.120000e+02 : f32
      %40 = vector.broadcast %cst_29 : f32 to vector<128x1xf32>
      %41 = arith.mulf %40, %38 : vector<128x1xf32>
      %42 = arith.subf %39, %41 : vector<128x1xf32>
      %c0_30 = arith.constant 0 : index
      %c0_31 = arith.constant 0 : index
      %43 = vector.load %arg2[%c0_30, %c0_31] : memref<128x128xf32, #tpu.memory_space<vmem>>, vector<128x128xf32>
      %c0_32 = arith.constant 0 : index
      %c0_33 = arith.constant 0 : index
      %44 = vector.load %arg4[%c0_32, %c0_33] : memref<128x128xf32, #tpu.memory_space<vmem>>, vector<128x128xf32>
      %45 = arith.mulf %43, %44 : vector<128x128xf32>
      %cst_34 = arith.constant dense<0.000000e+00> : vector<128xf32>
      %46 = vector.multi_reduction <add>, %45, %cst_34 [1] : vector<128x128xf32> to vector<128xf32>
      %47 = vector.shape_cast %46 : vector<128xf32> to vector<128x1xf32>
      %c0_35 = arith.constant 0 : index
      %c0_36 = arith.constant 0 : index
      %48 = vector.load %arg5[%c0_35, %c0_36] : memref<128x128xf32, #tpu.memory_space<vmem>>, vector<128x128xf32>
      %49 = arith.mulf %43, %48 : vector<128x128xf32>
      %cst_37 = arith.constant dense<0.000000e+00> : vector<128xf32>
      %50 = vector.multi_reduction <add>, %49, %cst_37 [1] : vector<128x128xf32> to vector<128xf32>
      %51 = vector.shape_cast %50 : vector<128xf32> to vector<128x1xf32>
      %c0_38 = arith.constant 0 : index
      %c0_39 = arith.constant 0 : index
      %52 = vector.load %arg6[%c0_38, %c0_39] : memref<1x128xf32, #tpu.memory_space<vmem>>, vector<1x128xf32>
      %53 = vector.broadcast %52 : vector<1x128xf32> to vector<128x128xf32>
      %54 = arith.mulf %43, %53 : vector<128x128xf32>
      %cst_40 = arith.constant dense<0.000000e+00> : vector<128xf32>
      %55 = vector.multi_reduction <add>, %54, %cst_40 [1] : vector<128x128xf32> to vector<128xf32>
      %56 = vector.shape_cast %55 : vector<128xf32> to vector<128x1xf32>
      %57 = arith.subf %47, %38 : vector<128x1xf32>
      %58 = arith.subf %56, %38 : vector<128x1xf32>
      %c0_41 = arith.constant 0 : index
      %c0_42 = arith.constant 0 : index
      %59 = vector.load %arg7[%c0_41, %c0_42] : memref<128x1xf32, #tpu.memory_space<vmem>>, vector<128x1xf32>
      %cst_43 = arith.constant 1.000000e+00 : f32
      %60 = vector.broadcast %cst_43 : f32 to vector<128x1xf32>
      %61 = arith.subf %60, %59 : vector<128x1xf32>
      %cst_44 = arith.constant 0.899999976 : f32
      %62 = vector.broadcast %cst_44 : f32 to vector<128x1xf32>
      %63 = arith.mulf %62, %57 : vector<128x1xf32>
      %cst_45 = arith.constant -0.948524057 : f32
      %64 = vector.broadcast %cst_45 : f32 to vector<128x1xf32>
      %65 = arith.subf %64, %63 : vector<128x1xf32>
      %66 = arith.subf %42, %58 : vector<128x1xf32>
      %67 = arith.subf %66, %57 : vector<128x1xf32>
      %cst_46 = arith.constant 1.96078428E-4 : f32
      %68 = vector.broadcast %cst_46 : f32 to vector<128x1xf32>
      %69 = arith.mulf %68, %67 : vector<128x1xf32>
      %70 = arith.subf %65, %69 : vector<128x1xf32>
      %71 = arith.mulf %70, %61 : vector<128x1xf32>
      %72 = arith.subf %47, %51 : vector<128x1xf32>
      %cst_47 = arith.constant 0.000000e+00 : f32
      %73 = vector.broadcast %cst_47 : f32 to vector<128x1xf32>
      %74 = arith.addf %72, %73 : vector<128x1xf32>
      %cst_48 = arith.constant 0.000000e+00 : f32
      %75 = vector.broadcast %cst_48 : f32 to vector<128x1xf32>
      %76 = arith.subf %75, %74 : vector<128x1xf32>
      %cst_49 = arith.constant 0.000000e+00 : f32
      %77 = vector.broadcast %cst_49 : f32 to vector<128x1xf32>
      %78 = arith.maximumf %77, %76 : vector<128x1xf32>
      %79 = arith.mulf %78, %61 : vector<128x1xf32>
      %c0_50 = arith.constant 0 : index
      %c0_51 = arith.constant 0 : index
      %80 = vector.load %arg8[%c0_50, %c0_51] : memref<1x1xf32, #tpu.memory_space<vmem>>, vector<1x1xf32>
      %81 = vector.shape_cast %71 : vector<128x1xf32> to vector<1x128x1xf32>
      %cst_52 = arith.constant dense<0.000000e+00> : vector<1xf32>
      %82 = vector.multi_reduction <add>, %81, %cst_52 [1, 2] : vector<1x128x1xf32> to vector<1xf32>
      %83 = vector.shape_cast %82 : vector<1xf32> to vector<1x1x1xf32>
      %84 = vector.extract %83[0, 0, 0] : f32 from vector<1x1x1xf32>
      %85 = vector.broadcast %84 : f32 to vector<1x1xf32>
      %86 = arith.addf %80, %85 : vector<1x1xf32>
      %c0_53 = arith.constant 0 : index
      %c0_54 = arith.constant 0 : index
      %87 = vector.load %arg8[%c0_53, %c0_54] : memref<1x1xf32, #tpu.memory_space<vmem>>, vector<1x1xf32>
      tpu.vector_store %arg8[%c0_53, %c0_54], %86 {strides = array<i32>} : memref<1x1xf32, #tpu.memory_space<vmem>>, vector<1x1xf32>,
      %c0_55 = arith.constant 0 : index
      %c0_56 = arith.constant 0 : index
      %88 = vector.load %arg9[%c0_55, %c0_56] : memref<1x1xf32, #tpu.memory_space<vmem>>, vector<1x1xf32>
      %89 = vector.shape_cast %79 : vector<128x1xf32> to vector<1x128x1xf32>
      %cst_57 = arith.constant dense<0.000000e+00> : vector<1xf32>
      %90 = vector.multi_reduction <add>, %89, %cst_57 [1, 2] : vector<1x128x1xf32> to vector<1xf32>
      %91 = vector.shape_cast %90 : vector<1xf32> to vector<1x1x1xf32>
      %92 = vector.extract %91[0, 0, 0] : f32 from vector<1x1x1xf32>
      %93 = vector.broadcast %92 : f32 to vector<1x1xf32>
      %94 = arith.addf %88, %93 : vector<1x1xf32>
      %c0_58 = arith.constant 0 : index
      %c0_59 = arith.constant 0 : index
      %95 = vector.load %arg9[%c0_58, %c0_59] : memref<1x1xf32, #tpu.memory_space<vmem>>, vector<1x1xf32>
      tpu.vector_store %arg9[%c0_58, %c0_59], %94 {strides = array<i32>} : memref<1x1xf32, #tpu.memory_space<vmem>>, vector<1x1xf32>,
    } else {
    }
    return
  }
  func.func @transform_0(%arg0: i32, %arg1: i32) -> (i32, i32) {
    %c0_i32 = arith.constant 0 : i32
    %c0_i32_0 = arith.constant 0 : i32
    return %arg0, %c0_i32 : i32, i32
  }
  func.func @transform_1(%arg0: i32, %arg1: i32) -> (i32, i32) {
    %c0_i32 = arith.constant 0 : i32
    %c0_i32_0 = arith.constant 0 : i32
    return %arg1, %c0_i32 : i32, i32
  }
  func.func @transform_2(%arg0: i32, %arg1: i32) -> (i32, i32) {
    %c0_i32 = arith.constant 0 : i32
    %c0_i32_0 = arith.constant 0 : i32
    return %arg0, %c0_i32 : i32, i32
  }
  func.func @transform_3(%arg0: i32, %arg1: i32) -> (i32, i32) {
    %c0_i32 = arith.constant 0 : i32
    %c0_i32_0 = arith.constant 0 : i32
    return %arg0, %c0_i32 : i32, i32
  }
  func.func @transform_4(%arg0: i32, %arg1: i32) -> (i32, i32) {
    %c0_i32 = arith.constant 0 : i32
    %c0_i32_0 = arith.constant 0 : i32
    %c0_i32_1 = arith.constant 0 : i32
    return %c0_i32, %c0_i32_0 : i32, i32
  }
  func.func @transform_5(%arg0: i32, %arg1: i32) -> (i32, i32) {
    %c0_i32 = arith.constant 0 : i32
    %c0_i32_0 = arith.constant 0 : i32
    return %arg0, %c0_i32 : i32, i32
  }
  func.func @transform_6(%arg0: i32, %arg1: i32) -> (i32, i32) {
    %c0_i32 = arith.constant 0 : i32
    %c0_i32_0 = arith.constant 0 : i32
    %c0_i32_1 = arith.constant 0 : i32
    return %c0_i32, %c0_i32_0 : i32, i32
  }
  func.func @transform_7(%arg0: i32, %arg1: i32) -> (i32, i32) {
    %c0_i32 = arith.constant 0 : i32
    %c0_i32_0 = arith.constant 0 : i32
    %c0_i32_1 = arith.constant 0 : i32
    return %c0_i32, %c0_i32_0 : i32, i32
  }
}

</mosaic_0001>

<bundles_post_ra>
// kernel: tpu_custom_call.1
= control target key start
LH: loop header
LB: loop body
LE: loop exit
PB: predicated region body
PF: predicated region fallthrough
CT: control target
= control target key end

     0   :  { %s3253_s0 = inlined_call_operand.vmem [shape: f32[128,128], index: 0, kind: input, shape index: {}]   ;;  %s3254_s1 = inlined_call_operand.hbm [shape: f32[512,128], index: 1, kind: input, shape index: {}]   ;;  %s3255_s2 = inlined_call_operand.hbm [shape: f32[128,128], index: 2, kind: input, shape index: {}]   ;;  %s3256_s3 = inlined_call_operand.hbm [shape: f32[128,128], index: 3, kind: input, shape index: {}]   ;;  %s3257_s4 = inlined_call_operand.vmem [shape: f32[1,128], index: 4, kind: input, shape index: {}]   ;;  %s3258_s5 = inlined_call_operand.vmem [shape: f32[128,1], index: 5, kind: input, shape index: {}]   ;;  %s3259_s6 = inlined_call_operand.hbm [shape: f32[1,1], index: 6, kind: output, shape index: {0}]   ;;  %s3260_s7 = inlined_call_operand.hbm [shape: f32[1,1], index: 7, kind: output, shape index: {1}]  }
   0x1   :  { %3264 = sst [smem:[#allocation18_spill]] %s3255_s2 }
   0x2   :  { %3265 = sst [smem:[#allocation19_spill]] %s3256_s3 }
   0x3   :  { %13 = vsyncpa [#allocation6], 0 }
   0x4   :  { %15 = vsyncpa [#allocation6 + $0x1], 0 }
   0x5   :  { %16 = vsyncpa [#allocation9], 0 }
   0x6   :  { %17 = vsyncpa [#allocation7], 0 }
   0x7   :  { %18 = vsyncpa [#allocation13], 0  ;;  %s2336_s24 = smov 0   ;;  %s2338_s25 = smov 0  }
   0x8   :  { %s2340_s26 = smov 0   ;;  %s2342_s27 = smov 0  }
   0x9   :  { %s2344_s28 = smov 0   ;;  %s2346_s29 = smov 0  }
   0xa LB: > { %s3261_s30 = sadd.s32 4294967295, %s2284_s29   ;;  %p82_p0 = scmp.ne.s32.totalorder %s2268_s25, %s2264_s24  ;;  %s2284_s29 = sphi %s2346_s29, %s24_s29   ;;  %s2280_s28 = sphi %s2344_s28, %s3296_s28   ;;  %s2276_s27 = sphi %s2342_s27, %s3295_s27   ;;  %s2272_s26 = sphi %s2340_s26, %s3294_s26   ;;  %s2268_s25 = sphi %s2338_s25, %s3293_s25   ;;  %s2264_s24 = sphi %s2336_s24, %s3292_s24  }
   0xb   : > { %p2368_p1 = scmp.eq.s32.totalorder %s3261_s30, 0  ;;  %p1804_p2 = scmp.ge.s32.totalorder %s2284_s29, 1 }
   0xc   : > { %p234_p3 = scmp.lt.s32.totalorder %s2284_s29, 5  ;;  %s3268_s2 = sld [smem:[#allocation18_spill]] }
   0xd   : > { %p2376_p4 = por %p2368_p1, %p82_p0  ;;  %s2286_s14 = smov [#allocation8]  }
   0xe   : > { %p2383_p5 = pnand %p1804_p2, %p234_p3  ;;  %s259_s15 = sshll.u32 %s2286_s14, 4  ;;  %s260_s15 = int_to_ptr.vmem [resolvable:$true] %s259_s15 }
   0xf   : > { %s3270_s3 = sld [smem:[#allocation19_spill]]  ;;  %s3262_s19 = smov 128  }
  0x10   : > { %p1898_p6 = pneg %p2383_p5  ;;  %s3263_s20 = smov 8  }
  0x11   : > { %s2289_s21 = smov [#allocation10]   ;;  %s33_s23 = sadd.s32 1, %s2280_s28 }
  0x12   : > { %s257_s12 = sshll.u32 %s3268_s2, 4  ;;  %p1899_p7 = pnand %p1898_p6, %p2368_p1  ;;  %s258_s12 = int_to_ptr.hbm [resolvable:$true] %s257_s12 }
  0x13   : > { %s276_s22 = sshll.u32 %s2289_s21, 4  ;;  %s69_s24 = sadd.s32 1, %s2272_s26  ;;  %s277_s22 = int_to_ptr.vmem [resolvable:$true] %s276_s22 }
  0x14   : > { %1901 = dma.hbm_to_vmem [thread:$0]  (!%p1899_p7), %s258_s12, 2048, %s260_s15, [#allocation9], %s3262_s19, %s3262_s19, %s3263_s20  }
  0x15   : > { %s274_s18 = sshll.u32 %s3270_s3, 4  ;;  %p34_p8 = scmp.ge.s32.totalorder %s33_s23, 4  ;;  %s275_s18 = int_to_ptr.hbm [resolvable:$true] %s274_s18 }
  0x16   : > { %1904 = dma.hbm_to_vmem [thread:$0]  (!%p1899_p7), %s275_s18, 2048, %s277_s22, [#allocation9], %s3262_s19, %s3262_s19, %s3263_s20  }
  0x17   : > { %p76_p9 = scmp.ne.s32.totalorder %s2272_s26, %s2268_s25  ;;  %p77_p10 = scmp.eq.s32.totalorder %s2284_s29, 0 }
  0x18   : > { %p1911_p11 = scmp.lt.s32.totalorder %s2284_s29, 4  ;;  %s3298_s23 = smov (%p34_p8, %s33_s23), 0 }
  0x19   : > { %p2408_p12 = por %p77_p10, %p76_p9  ;;  %s302_s11 = sand.u32 1, %s2272_s26  }
  0x1a   : > { %s66_s12 = ssub.s32 %s2280_s28, %s3298_s23  ;;  %s1810_s14 = sshll.u32 %s302_s11, 7 }
  0x1b   : > { %p67_p13 = scmp.eq.s32.totalorder %s66_s12, 0  ;;  %s1826_s15 = sshll.u32 %s2280_s28, 7 }
  0x1c   : > { %s311_s21 = scalar_lea.hbm %s3254_s1, %s1826_s15  ;;  %s306_s22 = scalar_lea.vmem [#allocation5], %s1810_s14 }
  0x1d   : > { %s2417_s16 = scalar_select %p67_p13, %s2272_s26, %s69_s24  }
  0x1e   : > { %s314_s30 = sshll.u32 %s306_s22, 4  ;;  %s312_s19 = sshll.u32 %s311_s21, 4  ;;  %s315_s30 = int_to_ptr.vmem [resolvable:$true] %s314_s30  ;;  %s313_s19 = int_to_ptr.hbm [resolvable:$true] %s312_s19 }
  0x1f   : > { %p1906_p0 = pnand %p1911_p11, %p2408_p12  ;;  %s303_s20 = scalar_lea.sflag [#allocation6], %s302_s11 }
  0x20   : > { %s3272_s2 = smov 8   ;;  %s3273_s3 = smov 128  }
  0x21   : > { %1908 = dma.hbm_to_vmem [thread:$0]  (!%p1906_p0), %s313_s19, 2048, %s315_s30, %s303_s20, %s3273_s3, %s3273_s3, %s3272_s2  }
  0x22   : > { %326 = sbr.rel (%p2383_p5) target bundleno = 1187 (0x4a3), region = 44  ;;  %s328_s24 = sand.u32 (!%p2383_p5), 1, %s2268_s25  }
  0x23   : > { %s1814_s12 = sshll.u32 (!%p2383_p5), %s328_s24, 7  ;;  %s329_s14 = scalar_lea.sflag (!%p2383_p5), [#allocation6], %s328_s24 }
  0x24   : > { %s2432_s15 = scalar_lea.vmem (!%p2383_p5), [#allocation5], %s1814_s12 }
  0x27   : > { %2247 = dma.done.wait (%p2376_p4), %s329_s14, 2048  }
  0x28   : > { %2249 = vsyncadd (%p2376_p4), %s329_s14, 4294965248 }
  0x29   : > { %2251 = dma.done.wait (%p2368_p1), [#allocation9], 4096  }
  0x2a   : > { %2253 = vsyncadd (%p2368_p1), [#allocation9], 4294963200  ;;  %p395_p2 = scmp.eq.s32.totalorder %s2276_s27, 0 }
  0x2b   : > { %vm400_vm0 = vcmask (%p395_p2), 0   ;;  %v2290_v0 = vmov (%p395_p2), 0.0  }
  0x2c   : > { %399 = sbr.rel (!%p395_p2) target bundleno = 49 (0x31), region = 60  ;;  %401 = vst.msk [vmem:[#allocation11] sm:$0x1] (%p395_p2), %vm400_vm0, %v2290_v0 }
  0x2d   : > { %402 = vst.msk [vmem:[#allocation12] sm:$0x1] (%p395_p2), %vm400_vm0, %v2290_v0 }
  0x31 PF: > { %p1818_p3 = scmp.ne.s32.totalorder %s2276_s27, 0 }
  0x33   : > { %405 = sbr.rel (%p1818_p3) target bundleno = 105 (0x69), region = 64 }
  0x38   : > { %vm406_vm1 = vcmask 7168   ;;  %v2291_v1 = vmov -inf   ;;  %v2292_v2 = vmov 0.0  }
  0x39   : > { %407 = vst.msk [vmem:[#allocation2] sm:$0xff] %vm406_vm1, %v2291_v1 }
  0x3a   : > { %408 = vst.msk [vmem:[#allocation2 + $0x8] sm:$0xff] %vm406_vm1, %v2291_v1 }
  0x3b   : > { %409 = vst.msk [vmem:[#allocation2 + $0x10] sm:$0xff] %vm406_vm1, %v2291_v1 }
  0x3c   : > { %410 = vst.msk [vmem:[#allocation2 + $0x18] sm:$0xff] %vm406_vm1, %v2291_v1 }
  0x3d   : > { %411 = vst.msk [vmem:[#allocation2 + $0x20] sm:$0xff] %vm406_vm1, %v2291_v1 }
  0x3e   : > { %412 = vst.msk [vmem:[#allocation2 + $0x28] sm:$0xff] %vm406_vm1, %v2291_v1 }
  0x3f   : > { %413 = vst.msk [vmem:[#allocation2 + $0x30] sm:$0xff] %vm406_vm1, %v2291_v1 }
  0x40   : > { %414 = vst.msk [vmem:[#allocation2 + $0x38] sm:$0xff] %vm406_vm1, %v2291_v1 }
  0x41   : > { %415 = vst.msk [vmem:[#allocation2 + $0x40] sm:$0xff] %vm406_vm1, %v2291_v1 }
  0x42   : > { %416 = vst.msk [vmem:[#allocation2 + $0x48] sm:$0xff] %vm406_vm1, %v2291_v1 }
  0x43   : > { %417 = vst.msk [vmem:[#allocation2 + $0x50] sm:$0xff] %vm406_vm1, %v2291_v1 }
  0x44   : > { %418 = vst.msk [vmem:[#allocation2 + $0x58] sm:$0xff] %vm406_vm1, %v2291_v1 }
  0x45   : > { %419 = vst.msk [vmem:[#allocation2 + $0x60] sm:$0xff] %vm406_vm1, %v2291_v1 }
  0x46   : > { %420 = vst.msk [vmem:[#allocation2 + $0x68] sm:$0xff] %vm406_vm1, %v2291_v1 }
  0x47   : > { %421 = vst.msk [vmem:[#allocation2 + $0x70] sm:$0xff] %vm406_vm1, %v2291_v1 }
  0x48   : > { %422 = vst.msk [vmem:[#allocation2 + $0x78] sm:$0xff] %vm406_vm1, %v2291_v1 }
  0x49   : > { %423 = vst.msk [vmem:[#allocation3] sm:$0xff] %vm406_vm1, %v2292_v2 }
  0x4a   : > { %424 = vst.msk [vmem:[#allocation3 + $0x8] sm:$0xff] %vm406_vm1, %v2292_v2 }
  0x4b   : > { %425 = vst.msk [vmem:[#allocation3 + $0x10] sm:$0xff] %vm406_vm1, %v2292_v2 }
  0x4c   : > { %426 = vst.msk [vmem:[#allocation3 + $0x18] sm:$0xff] %vm406_vm1, %v2292_v2 }
  0x4d   : > { %427 = vst.msk [vmem:[#allocation3 + $0x20] sm:$0xff] %vm406_vm1, %v2292_v2 }
  0x4e   : > { %428 = vst.msk [vmem:[#allocation3 + $0x28] sm:$0xff] %vm406_vm1, %v2292_v2 }
  0x4f   : > { %429 = vst.msk [vmem:[#allocation3 + $0x30] sm:$0xff] %vm406_vm1, %v2292_v2 }
  0x50   : > { %430 = vst.msk [vmem:[#allocation3 + $0x38] sm:$0xff] %vm406_vm1, %v2292_v2 }
  0x51   : > { %431 = vst.msk [vmem:[#allocation3 + $0x40] sm:$0xff] %vm406_vm1, %v2292_v2 }
  0x52   : > { %432 = vst.msk [vmem:[#allocation3 + $0x48] sm:$0xff] %vm406_vm1, %v2292_v2 }
  0x53   : > { %433 = vst.msk [vmem:[#allocation3 + $0x50] sm:$0xff] %vm406_vm1, %v2292_v2 }
  0x54   : > { %434 = vst.msk [vmem:[#allocation3 + $0x58] sm:$0xff] %vm406_vm1, %v2292_v2 }
  0x55   : > { %435 = vst.msk [vmem:[#allocation3 + $0x60] sm:$0xff] %vm406_vm1, %v2292_v2 }
  0x56   : > { %436 = vst.msk [vmem:[#allocation3 + $0x68] sm:$0xff] %vm406_vm1, %v2292_v2 }
  0x57   : > { %437 = vst.msk [vmem:[#allocation3 + $0x70] sm:$0xff] %vm406_vm1, %v2292_v2 }
  0x58   : > { %438 = vst.msk [vmem:[#allocation3 + $0x78] sm:$0xff] %vm406_vm1, %v2292_v2 }
  0x59   : > { %439 = vst.msk [vmem:[#allocation4] sm:$0xff] %vm406_vm1, %v2292_v2 }
  0x5a   : > { %440 = vst.msk [vmem:[#allocation4 + $0x8] sm:$0xff] %vm406_vm1, %v2292_v2 }
  0x5b   : > { %441 = vst.msk [vmem:[#allocation4 + $0x10] sm:$0xff] %vm406_vm1, %v2292_v2 }
  0x5c   : > { %442 = vst.msk [vmem:[#allocation4 + $0x18] sm:$0xff] %vm406_vm1, %v2292_v2 }
  0x5d   : > { %443 = vst.msk [vmem:[#allocation4 + $0x20] sm:$0xff] %vm406_vm1, %v2292_v2 }
  0x5e   : > { %444 = vst.msk [vmem:[#allocation4 + $0x28] sm:$0xff] %vm406_vm1, %v2292_v2 }
  0x5f   : > { %445 = vst.msk [vmem:[#allocation4 + $0x30] sm:$0xff] %vm406_vm1, %v2292_v2 }
  0x60   : > { %446 = vst.msk [vmem:[#allocation4 + $0x38] sm:$0xff] %vm406_vm1, %v2292_v2 }
  0x61   : > { %447 = vst.msk [vmem:[#allocation4 + $0x40] sm:$0xff] %vm406_vm1, %v2292_v2 }
  0x62   : > { %448 = vst.msk [vmem:[#allocation4 + $0x48] sm:$0xff] %vm406_vm1, %v2292_v2 }
  0x63   : > { %449 = vst.msk [vmem:[#allocation4 + $0x50] sm:$0xff] %vm406_vm1, %v2292_v2 }
  0x64   : > { %450 = vst.msk [vmem:[#allocation4 + $0x58] sm:$0xff] %vm406_vm1, %v2292_v2 }
  0x65   : > { %451 = vst.msk [vmem:[#allocation4 + $0x60] sm:$0xff] %vm406_vm1, %v2292_v2 }
  0x66   : > { %452 = vst.msk [vmem:[#allocation4 + $0x68] sm:$0xff] %vm406_vm1, %v2292_v2 }
  0x67   : > { %453 = vst.msk [vmem:[#allocation4 + $0x70] sm:$0xff] %vm406_vm1, %v2292_v2 }
  0x68   : > { %454 = vst.msk [vmem:[#allocation4 + $0x78] sm:$0xff] %vm406_vm1, %v2292_v2 }
  0x69 PF: > { %v486_v3 = vld [vmem:[%s2432_s15 + $0x78] sm:$0xff]  ;;  %v485_v4 = vld [vmem:[%s2432_s15 + $0x70] sm:$0xff]  ;;  %v484_v5 = vld [vmem:[%s2432_s15 + $0x68] sm:$0xff]  ;;  %v2293_v51 = vmov 0   ;;  %vm872_vm2 = vcmask 7168   ;;  %p1819_p1 = scmp.ne.s32.totalorder %s2276_s27, 3 }
  0x6a   : > { %487 = vmatpush.xpose.msra.mxu0 %v486_v3  ;;  %1828 = vmatpush.xpose.msra.mxu1 %v486_v3  ;;  %v483_v6 = vld [vmem:[%s2432_s15 + $0x60] sm:$0xff]  ;;  %v482_v7 = vld [vmem:[%s2432_s15 + $0x58] sm:$0xff]  ;;  %v481_v8 = vld [vmem:[%s2432_s15 + $0x50] sm:$0xff] }
  0x6b   : > { %1830 = vmatpush.xpose.msra.mxu3 %v486_v3  ;;  %1829 = vmatpush.xpose.msra.mxu2 %v486_v3  ;;  %v480_v9 = vld [vmem:[%s2432_s15 + $0x48] sm:$0xff]  ;;  %v479_v10 = vld [vmem:[%s2432_s15 + $0x40] sm:$0xff]  ;;  %v478_v11 = vld [vmem:[%s2432_s15 + $0x38] sm:$0xff] }
  0x6c   : > { %v477_v12 = vld [vmem:[%s2432_s15 + $0x30] sm:$0xff]  ;;  %v476_v13 = vld [vmem:[%s2432_s15 + $0x28] sm:$0xff]  ;;  %v475_v14 = vld [vmem:[%s2432_s15 + $0x20] sm:$0xff]  ;;  %1976 = vset.pattern.permute.xlu1 %v2293_v51  ;;  %1977 = vset.pattern.permute.xlu0 %v2293_v51 }
  0x6d   : > { %v474_v15 = vld [vmem:[%s2432_s15 + $0x18] sm:$0xff]  ;;  %v473_v16 = vld [vmem:[%s2432_s15 + $0x10] sm:$0xff]  ;;  %v472_v17 = vld [vmem:[%s2432_s15 + $0x8] sm:$0xff]  ;;  %1978 = vset.pattern.permute.xlu2 %v2293_v51 }
  0x6e   : > { %488 = vmatpush.xpose.msra.mxu0 %v485_v4  ;;  %1831 = vmatpush.xpose.msra.mxu1 %v485_v4  ;;  %v471_v18 = vld [vmem:[%s2432_s15] sm:$0xff]  ;;  %v456_v23 = vld [vmem:[%s3253_s0 + $0x8] sm:$0xff]  ;;  %v457_v27 = vld [vmem:[%s3253_s0 + $0x10] sm:$0xff] }
  0x6f   : > { %1833 = vmatpush.xpose.msra.mxu3 %v485_v4  ;;  %1832 = vmatpush.xpose.msra.mxu2 %v485_v4  ;;  %v455_v19 = vld [vmem:[%s3253_s0] sm:$0xff]  ;;  %v460_v24 = vld [vmem:[%s3253_s0 + $0x28] sm:$0xff]  ;;  %v461_v28 = vld [vmem:[%s3253_s0 + $0x30] sm:$0xff] }
  0x70   : > { %v459_v20 = vld [vmem:[%s3253_s0 + $0x20] sm:$0xff]  ;;  %v468_v25 = vld [vmem:[%s3253_s0 + $0x68] sm:$0xff]  ;;  %v469_v29 = vld [vmem:[%s3253_s0 + $0x70] sm:$0xff] }
  0x71   : > { %v467_v21 = vld [vmem:[%s3253_s0 + $0x60] sm:$0xff]  ;;  %v464_v26 = vld [vmem:[%s3253_s0 + $0x48] sm:$0xff]  ;;  %v465_v30 = vld [vmem:[%s3253_s0 + $0x50] sm:$0xff] }
  0x72   : > { %489 = vmatpush.xpose.msra.mxu0 %v484_v5  ;;  %1834 = vmatpush.xpose.msra.mxu1 %v484_v5  ;;  %v463_v22 = vld [vmem:[%s3253_s0 + $0x40] sm:$0xff]  ;;  %v458_v31 = vld [vmem:[%s3253_s0 + $0x18] sm:$0xff] }
  0x73   : > { %1836 = vmatpush.xpose.msra.mxu3 %v484_v5  ;;  %1835 = vmatpush.xpose.msra.mxu2 %v484_v5  ;;  %v462_v32 = vld [vmem:[%s3253_s0 + $0x38] sm:$0xff]  ;;  %v2617_v52 = vld [vmem:[#allocation2 + $0x20] sm:$0xff] }
  0x74   : > { %v466_v33 = vld [vmem:[%s3253_s0 + $0x58] sm:$0xff]  ;;  %v889_v53 = vld [vmem:[#allocation4] sm:$0xff] }
  0x75   : > { %v470_v34 = vld [vmem:[%s3253_s0 + $0x78] sm:$0xff]  ;;  %v2619_v54 = vld [vmem:[#allocation2] sm:$0xff] }
  0x76   : > { %490 = vmatpush.xpose.msra.mxu0 %v483_v6  ;;  %1837 = vmatpush.xpose.msra.mxu1 %v483_v6  ;;  %v893_v63 = vld [vmem:[#allocation4 + $0x20] sm:$0xff] }
  0x77   : > { %1839 = vmatpush.xpose.msra.mxu3 %v483_v6  ;;  %1838 = vmatpush.xpose.msra.mxu2 %v483_v6  ;;  %v901_v0 = vld [vmem:[#allocation4 + $0x60] sm:$0xff] }
  0x78   : > { %v2637_v1 = vld [vmem:[#allocation2 + $0x60] sm:$0xff] }
  0x7a   : > { %491 = vmatpush.xpose.msra.mxu0 %v482_v7  ;;  %1840 = vmatpush.xpose.msra.mxu1 %v482_v7 }
  0x7b   : > { %1842 = vmatpush.xpose.msra.mxu3 %v482_v7  ;;  %1841 = vmatpush.xpose.msra.mxu2 %v482_v7 }
  0x7e   : > { %492 = vmatpush.xpose.msra.mxu0 %v481_v8  ;;  %1843 = vmatpush.xpose.msra.mxu1 %v481_v8 }
  0x7f   : > { %1845 = vmatpush.xpose.msra.mxu3 %v481_v8  ;;  %1844 = vmatpush.xpose.msra.mxu2 %v481_v8 }
  0x82   : > { %493 = vmatpush.xpose.msra.mxu0 %v480_v9  ;;  %1846 = vmatpush.xpose.msra.mxu1 %v480_v9 }
  0x83   : > { %1848 = vmatpush.xpose.msra.mxu3 %v480_v9  ;;  %1847 = vmatpush.xpose.msra.mxu2 %v480_v9  ;;  %v2650_v9 = vld [vmem:[#allocation2 + $0x40] sm:$0xff] }
  0x86   : > { %494 = vmatpush.xpose.msra.mxu0 %v479_v10  ;;  %1849 = vmatpush.xpose.msra.mxu1 %v479_v10 }
  0x87   : > { %1851 = vmatpush.xpose.msra.mxu3 %v479_v10  ;;  %1850 = vmatpush.xpose.msra.mxu2 %v479_v10  ;;  %v2652_v10 = vld [vmem:[#allocation2 + $0x68] sm:$0xff] }
  0x8a   : > { %495 = vmatpush.xpose.msra.mxu0 %v478_v11  ;;  %1852 = vmatpush.xpose.msra.mxu1 %v478_v11 }
  0x8b   : > { %1854 = vmatpush.xpose.msra.mxu3 %v478_v11  ;;  %1853 = vmatpush.xpose.msra.mxu2 %v478_v11  ;;  %v897_v11 = vld [vmem:[#allocation4 + $0x40] sm:$0xff] }
  0x8e   : > { %496 = vmatpush.xpose.msra.mxu0 %v477_v12  ;;  %1855 = vmatpush.xpose.msra.mxu1 %v477_v12 }
  0x8f   : > { %1857 = vmatpush.xpose.msra.mxu3 %v477_v12  ;;  %1856 = vmatpush.xpose.msra.mxu2 %v477_v12 }
  0x92   : > { %497 = vmatpush.xpose.msra.mxu0 %v476_v13  ;;  %1858 = vmatpush.xpose.msra.mxu1 %v476_v13 }
  0x93   : > { %1860 = vmatpush.xpose.msra.mxu3 %v476_v13  ;;  %1859 = vmatpush.xpose.msra.mxu2 %v476_v13 }
  0x96   : > { %498 = vmatpush.xpose.msra.mxu0 %v475_v14  ;;  %1861 = vmatpush.xpose.msra.mxu1 %v475_v14 }
  0x97   : > { %1863 = vmatpush.xpose.msra.mxu3 %v475_v14  ;;  %1862 = vmatpush.xpose.msra.mxu2 %v475_v14 }
  0x9a   : > { %499 = vmatpush.xpose.msra.mxu0 %v474_v15  ;;  %1864 = vmatpush.xpose.msra.mxu1 %v474_v15 }
  0x9b   : > { %1866 = vmatpush.xpose.msra.mxu3 %v474_v15  ;;  %1865 = vmatpush.xpose.msra.mxu2 %v474_v15 }
  0x9e   : > { %500 = vmatpush.xpose.msra.mxu0 %v473_v16  ;;  %1867 = vmatpush.xpose.msra.mxu1 %v473_v16 }
  0x9f   : > { %1869 = vmatpush.xpose.msra.mxu3 %v473_v16  ;;  %1868 = vmatpush.xpose.msra.mxu2 %v473_v16 }
  0xa2   : > { %501 = vmatpush.xpose.msra.mxu0 %v472_v17  ;;  %1870 = vmatpush.xpose.msra.mxu1 %v472_v17 }
  0xa3   : > { %1872 = vmatpush.xpose.msra.mxu3 %v472_v17  ;;  %1871 = vmatpush.xpose.msra.mxu2 %v472_v17 }
  0xa6   : > { %502 = vmatpush.xpose.msra.mxu0 %v471_v18  ;;  %1873 = vmatpush.xpose.msra.mxu1 %v471_v18 }
  0xa7   : > { %1875 = vmatpush.xpose.msra.mxu3 %v471_v18  ;;  %1874 = vmatpush.xpose.msra.mxu2 %v471_v18 }
  0xa9   : > { %503 = vmatmul.f32.vlgmr.msra.gmra.mxu0 %v455_v19  ;;  %515 = vmatmul.f32.vlgmr.msra.gmra.mxu1 %v459_v20  ;;  %v2670_v20 = vld [vmem:[#allocation2 + $0x28] sm:$0xff] }
  0xaa   : > { %539 = vmatmul.f32.vlgmr.msra.gmra.mxu3 %v467_v21  ;;  %527 = vmatmul.f32.vlgmr.msra.gmra.mxu2 %v463_v22  ;;  %v898_v21 = vld [vmem:[#allocation4 + $0x48] sm:$0xff] }
  0xab   : > { %v2672_v22 = vld [vmem:[#allocation2 + $0x8] sm:$0xff] }
  0xb1   : > { %506 = vmatmul.f32.gmra.mxu0 %v456_v23  ;;  %518 = vmatmul.f32.gmra.mxu1 %v460_v24 }
  0xb2   : > { %542 = vmatmul.f32.gmra.mxu3 %v468_v25  ;;  %530 = vmatmul.f32.gmra.mxu2 %v464_v26 }
  0xb9   : > { %509 = vmatmul.f32.gmra.mxu0 %v457_v27  ;;  %521 = vmatmul.f32.gmra.mxu1 %v461_v28 }
  0xba   : > { %545 = vmatmul.f32.gmra.mxu3 %v469_v29  ;;  %533 = vmatmul.f32.gmra.mxu2 %v465_v30 }
  0xc1   : > { %512 = vmatmul.f32.gmra.mxu0 %v458_v31  ;;  %524 = vmatmul.f32.gmra.mxu1 %v462_v32  ;;  %v890_v31 = vld [vmem:[#allocation4 + $0x8] sm:$0xff]  ;;  %v2690_v32 = vld [vmem:[#allocation2 + $0x10] sm:$0xff] }
  0xc2   : > { %536 = vmatmul.f32.gmra.mxu2 %v466_v33  ;;  %548 = vmatmul.f32.gmra.mxu3 %v470_v34  ;;  %v894_v33 = vld [vmem:[#allocation4 + $0x28] sm:$0xff] }
 0x126   : > { %v2556_v35 = vpop.f32.mrf.mxu0  ;;  %v2558_v36 = vpop.f32.mrf.mxu1 }
 0x127   : > { %576 = vmax.xlane.f32.xlu2 %v2558_v36  ;;  %905 = vadd.xlane.f32.xlu1 %v2556_v35 }
 0x128   : > { %568 = vmax.xlane.f32.xlu0 %v2556_v35 }
 0x12d   : > { %v2563_v37 = vpop.f32.mrf.mxu3  ;;  %v2568_v38 = vpop.f32.mrf.mxu2 }
 0x12e   : > { %v2575_v40 = vpop.f32.mrf.mxu0  ;;  %v2577_v41 = vpop.f32.mrf.mxu1 }
 0x12f   : > { %913 = vadd.xlane.f32.xlu2 %v2558_v36  ;;  %929 = vadd.xlane.f32.xlu1 %v2563_v37 }
 0x130   : > { %592 = vmax.xlane.f32.xlu0 %v2563_v37 }
 0x135   : > { %v2570_v39 = vpop.f32.mrf.mxu3  ;;  %v2579_v42 = vpop.f32.mrf.mxu2 }
 0x136   : > { %v2584_v43 = vpop.f32.mrf.mxu0  ;;  %v2589_v44 = vpop.f32.mrf.mxu1 }
 0x137   : > { %584 = vmax.xlane.f32.xlu2 %v2568_v38  ;;  %594 = vmax.xlane.f32.xlu1 %v2570_v39 }
 0x138   : > { %921 = vadd.xlane.f32.xlu0 %v2568_v38 }
 0x13d   : > { %v2591_v45 = vpop.f32.mrf.mxu3  ;;  %v2596_v46 = vpop.f32.mrf.mxu2 }
 0x13e   : > { %v2601_v47 = vpop.f32.mrf.mxu0  ;;  %v2603_v48 = vpop.f32.mrf.mxu1 }
 0x13f   : > { %578 = vmax.xlane.f32.xlu2 %v2577_v41  ;;  %923 = vadd.xlane.f32.xlu1 %v2579_v42 }
 0x140   : > { %570 = vmax.xlane.f32.xlu0 %v2575_v40 }
 0x145   : > { %v2608_v49 = vpop.f32.mrf.mxu2  ;;  %v2610_v50 = vpop.f32.mrf.mxu3 }
 0x147   : > { %907 = vadd.xlane.f32.xlu2 %v2575_v40  ;;  %572 = vmax.xlane.f32.xlu1 %v2584_v43 }
 0x148   : > { %915 = vadd.xlane.f32.xlu0 %v2577_v41 }
 0x14f   : > { %596 = vmax.xlane.f32.xlu2 %v2591_v45  ;;  %917 = vadd.xlane.f32.xlu1 %v2589_v44 }
 0x150   : > { %586 = vmax.xlane.f32.xlu0 %v2579_v42 }
 0x157   : > { %925 = vadd.xlane.f32.xlu2 %v2596_v46  ;;  %588 = vmax.xlane.f32.xlu1 %v2596_v46 }
 0x158   : > { %580 = vmax.xlane.f32.xlu0 %v2589_v44 }
 0x15f   : > { %919 = vadd.xlane.f32.xlu2 %v2603_v48  ;;  %574 = vmax.xlane.f32.xlu1 %v2601_v47 }
 0x160   : > { %909 = vadd.xlane.f32.xlu0 %v2584_v43 }
 0x167   : > { %590 = vmax.xlane.f32.xlu2 %v2608_v49  ;;  %582 = vmax.xlane.f32.xlu1 %v2603_v48 }
 0x168   : > { %598 = vmax.xlane.f32.xlu0 %v2610_v50 }
 0x16f   : > { %911 = vadd.xlane.f32.xlu1 %v2601_v47 }
 0x170   : > { %927 = vadd.xlane.f32.xlu0 %v2608_v49 }
 0x19a   : > { %v577_v55 = vpop.xlane.xlu2 %576  ;;  %v906_v56 = vpop.xlane.xlu1 %905 }
 0x19b   : > { %v2622_v57 = vmax.f32 %v2617_v52, %v577_v55  ;;  %v937_v58 = vadd.f32 %v906_v56, %v889_v53  ;;  %v569_v59 = vpop.xlane.xlu0 %568 }
 0x19c   : > { %v2625_v60 = vmax.f32 %v2619_v54, %v569_v59 }
 0x19d   : > { %973 = vst.msk [vmem:[#allocation2 + $0x20] sm:$0xff] %vm872_vm2, %v2622_v57 }
 0x19e   : > { %953 = vst.msk [vmem:[#allocation4] sm:$0xff] %vm872_vm2, %v937_v58  ;;  %698 = vperm.xlu1 %1976, %v2625_v60  }
 0x19f   : > { %969 = vst.msk [vmem:[#allocation2] sm:$0xff] %vm872_vm2, %v2625_v60 }
 0x1a2   : > { %v914_v2 = vpop.xlane.xlu2 %913  ;;  %v930_v3 = vpop.xlane.xlu1 %929 }
 0x1a3   : > { %v941_v4 = vadd.f32 %v914_v2, %v893_v63  ;;  %v949_v5 = vadd.f32 %v930_v3, %v901_v0  ;;  %v593_v6 = vpop.xlane.xlu0 %592  ;;  %v2702_v63 = vld [vmem:[#allocation2 + $0x70] sm:$0xff]  ;;  %v2704_v2 = vld [vmem:[#allocation2 + $0x48] sm:$0xff] }
 0x1a4   : > { %v2640_v7 = vmax.f32 %v2637_v1, %v593_v6  ;;  %v895_v0 = vld [vmem:[#allocation4 + $0x30] sm:$0xff] }
 0x1a5   : > { %957 = vst.msk [vmem:[#allocation4 + $0x20] sm:$0xff] %vm872_vm2, %v941_v4 }
 0x1a6   : > { %965 = vst.msk [vmem:[#allocation4 + $0x60] sm:$0xff] %vm872_vm2, %v949_v5  ;;  %758 = vperm.xlu0 %1977, %v2640_v7   ;;  %718 = vperm.xlu1 %1976, %v2622_v57  }
 0x1a7   : > { %981 = vst.msk [vmem:[#allocation2 + $0x60] sm:$0xff] %vm872_vm2, %v2640_v7 }
 0x1aa   : > { %v585_v12 = vpop.xlane.xlu2 %584  ;;  %v595_v13 = vpop.xlane.xlu1 %594 }
 0x1ab   : > { %v2655_v14 = vmax.f32 %v2650_v9, %v585_v12  ;;  %v2658_v15 = vmax.f32 %v2652_v10, %v595_v13  ;;  %v922_v16 = vpop.xlane.xlu0 %921 }
 0x1ac   : > { %v945_v17 = vadd.f32 %v922_v16, %v897_v11 }
 0x1ad   : > { %977 = vst.msk [vmem:[#allocation2 + $0x40] sm:$0xff] %vm872_vm2, %v2655_v14 }
 0x1ae   : > { %982 = vst.msk [vmem:[#allocation2 + $0x68] sm:$0xff] %vm872_vm2, %v2658_v15  ;;  %738 = vperm.xlu1 %1976, %v2655_v14  }
 0x1af   : > { %961 = vst.msk [vmem:[#allocation4 + $0x40] sm:$0xff] %vm872_vm2, %v945_v17  ;;  %v899_v17 = vld [vmem:[#allocation4 + $0x50] sm:$0xff] }
 0x1b2   : > { %v579_v23 = vpop.xlane.xlu2 %578  ;;  %v924_v24 = vpop.xlane.xlu1 %923 }
 0x1b3   : > { %v2675_v25 = vmax.f32 %v2670_v20, %v579_v23  ;;  %v946_v26 = vadd.f32 %v924_v24, %v898_v21  ;;  %v571_v27 = vpop.xlane.xlu0 %570  ;;  %v2723_v21 = vld [vmem:[#allocation2 + $0x50] sm:$0xff] }
 0x1b4   : > { %v2678_v28 = vmax.f32 %v2672_v22, %v571_v27  ;;  %v2725_v23 = vld [vmem:[#allocation2 + $0x30] sm:$0xff] }
 0x1b5   : > { %974 = vst.msk [vmem:[#allocation2 + $0x28] sm:$0xff] %vm872_vm2, %v2675_v25 }
 0x1b6   : > { %962 = vst.msk [vmem:[#allocation4 + $0x48] sm:$0xff] %vm872_vm2, %v946_v26  ;;  %703 = vperm.xlu2 %1978, %v2678_v28  }
 0x1b7   : > { %970 = vst.msk [vmem:[#allocation2 + $0x8] sm:$0xff] %vm872_vm2, %v2678_v28 }
 0x1ba   : > { %v908_v34 = vpop.xlane.xlu2 %907  ;;  %v573_v51 = vpop.xlane.xlu1 %572 }
 0x1bb   : > { %v938_v53 = vadd.f32 %v908_v34, %v890_v31  ;;  %v916_v55 = vpop.xlane.xlu0 %915  ;;  %v2693_v56 = vmax.f32 %v2690_v32, %v573_v51 }
 0x1bc   : > { %v942_v58 = vadd.f32 %v916_v55, %v894_v33  ;;  %v896_v55 = vld [vmem:[#allocation4 + $0x38] sm:$0xff] }
 0x1bd   : > { %954 = vst.msk [vmem:[#allocation4 + $0x8] sm:$0xff] %vm872_vm2, %v938_v53 }
 0x1be   : > { %958 = vst.msk [vmem:[#allocation4 + $0x28] sm:$0xff] %vm872_vm2, %v942_v58  ;;  %723 = vperm.xlu2 %1978, %v2675_v25   ;;  %v2745_v58 = vld [vmem:[#allocation2 + $0x18] sm:$0xff] }
 0x1bf   : > { %971 = vst.msk [vmem:[#allocation2 + $0x10] sm:$0xff] %vm872_vm2, %v2693_v56 }
 0x1c2   : > { %v597_v3 = vpop.xlane.xlu2 %596  ;;  %v918_v4 = vpop.xlane.xlu1 %917 }
 0x1c3   : > { %v2707_v5 = vmax.f32 %v2702_v63, %v597_v3  ;;  %v587_v6 = vpop.xlane.xlu0 %586  ;;  %v943_v11 = vadd.f32 %v918_v4, %v895_v0  ;;  %v891_v0 = vld [vmem:[#allocation4 + $0x10] sm:$0xff] }
 0x1c4   : > { %v2710_v12 = vmax.f32 %v2704_v2, %v587_v6 }
 0x1c5   : > { %983 = vst.msk [vmem:[#allocation2 + $0x70] sm:$0xff] %vm872_vm2, %v2707_v5 }
 0x1c6   : > { %978 = vst.msk [vmem:[#allocation2 + $0x48] sm:$0xff] %vm872_vm2, %v2710_v12  ;;  %763 = vperm.xlu2 %1978, %v2658_v15   ;;  %743 = vperm.xlu0 %1977, %v2710_v12  }
 0x1c7   : > { %959 = vst.msk [vmem:[#allocation4 + $0x30] sm:$0xff] %vm872_vm2, %v943_v11 }
 0x1ca   : > { %v926_v24 = vpop.xlane.xlu2 %925  ;;  %v589_v26 = vpop.xlane.xlu1 %588 }
 0x1cb   : > { %v947_v27 = vadd.f32 %v926_v24, %v899_v17  ;;  %v581_v31 = vpop.xlane.xlu0 %580  ;;  %v2728_v33 = vmax.f32 %v2723_v21, %v589_v26 }
 0x1cc   : > { %v2731_v34 = vmax.f32 %v2725_v23, %v581_v31  ;;  %v2760_v31 = vld [vmem:[#allocation2 + $0x38] sm:$0xff] }
 0x1cd   : > { %963 = vst.msk [vmem:[#allocation4 + $0x50] sm:$0xff] %vm872_vm2, %v947_v27  ;;  %v2758_v27 = vld [vmem:[#allocation2 + $0x58] sm:$0xff] }
 0x1ce   : > { %975 = vst.msk [vmem:[#allocation2 + $0x30] sm:$0xff] %vm872_vm2, %v2731_v34  ;;  %708 = vperm.xlu0 %1977, %v2693_v56   ;;  %748 = vperm.xlu2 %1978, %v2728_v33  }
 0x1cf   : > { %979 = vst.msk [vmem:[#allocation2 + $0x50] sm:$0xff] %vm872_vm2, %v2728_v33  ;;  %728 = vperm.xlu1 %1976, %v2731_v34  }
 0x1d2   : > { %v920_v3 = vpop.xlane.xlu2 %919  ;;  %v575_v4 = vpop.xlane.xlu1 %574 }
 0x1d3   : > { %v944_v6 = vadd.f32 %v920_v3, %v896_v55  ;;  %v910_v11 = vpop.xlane.xlu0 %909  ;;  %v2748_v17 = vmax.f32 %v2745_v58, %v575_v4  ;;  %v2762_v55 = vld [vmem:[#allocation2 + $0x78] sm:$0xff] }
 0x1d4   : > { %v939_v24 = vadd.f32 %v910_v11, %v891_v0 }
 0x1d5   : > { %960 = vst.msk [vmem:[#allocation4 + $0x38] sm:$0xff] %vm872_vm2, %v944_v6 }
 0x1d6   : > { %955 = vst.msk [vmem:[#allocation4 + $0x10] sm:$0xff] %vm872_vm2, %v939_v24  ;;  %713 = vperm.xlu2 %1978, %v2748_v17  }
 0x1d7   : > { %972 = vst.msk [vmem:[#allocation2 + $0x18] sm:$0xff] %vm872_vm2, %v2748_v17  ;;  %768 = vperm.xlu1 %1976, %v2707_v5  }
 0x1da   : > { %v591_v0 = vpop.xlane.xlu2 %590  ;;  %v583_v3 = vpop.xlane.xlu1 %582 }
 0x1db   : > { %v2765_v4 = vmax.f32 %v2758_v27, %v591_v0  ;;  %v599_v6 = vpop.xlane.xlu0 %598  ;;  %v2768_v11 = vmax.f32 %v2760_v31, %v583_v3  ;;  %v892_v3 = vld [vmem:[#allocation4 + $0x18] sm:$0xff] }
 0x1dc   : > { %v2771_v24 = vmax.f32 %v2762_v55, %v599_v6  ;;  %v900_v6 = vld [vmem:[#allocation4 + $0x58] sm:$0xff] }
 0x1dd   : > { %980 = vst.msk [vmem:[#allocation2 + $0x58] sm:$0xff] %vm872_vm2, %v2765_v4 }
 0x1de   : > { %984 = vst.msk [vmem:[#allocation2 + $0x78] sm:$0xff] %vm872_vm2, %v2771_v24  ;;  %773 = vperm.xlu0 %1977, %v2771_v24   ;;  %733 = vperm.xlu2 %1978, %v2768_v11  }
 0x1df   : > { %976 = vst.msk [vmem:[#allocation2 + $0x38] sm:$0xff] %vm872_vm2, %v2768_v11  ;;  %753 = vperm.xlu1 %1976, %v2765_v4  }
 0x1e2   : > { %v912_v26 = vpop.xlane.xlu1 %911 }
 0x1e3   : > { %v928_v53 = vpop.xlane.xlu0 %927  ;;  %v940_v59 = vadd.f32 %v912_v26, %v892_v3 }
 0x1e4   : > { %v948_v13 = vadd.f32 %v928_v53, %v900_v6 }
 0x1e5   : > { %956 = vst.msk [vmem:[#allocation4 + $0x18] sm:$0xff] %vm872_vm2, %v940_v59 }
 0x1e6   : > { %964 = vst.msk [vmem:[#allocation4 + $0x58] sm:$0xff] %vm872_vm2, %v948_v13 }
 0x210   : > { %v704_v0 = vpop.permute.xlu2 %703  ;;  %v699_v16 = vpop.permute.xlu1 %698 }
 0x211   : > { %v776_v51 = vsub.f32 %v2556_v35, %v699_v16  ;;  %v777_v59 = vsub.f32 %v2575_v40, %v704_v0 }
 0x213   : > { %v792_v19 = vmul.f32 1.442695, %v776_v51 }
 0x215   : > { %1979 = vpow2.f32 %v792_v19  ;;  %v794_v19 = vmul.f32 1.442695, %v777_v59 }
 0x218   : > { %v724_v29 = vpop.permute.xlu2 %723  ;;  %v759_v30 = vpop.permute.xlu0 %758 }
 0x219   : > { %v788_v18 = vsub.f32 %v2563_v37, %v759_v30  ;;  %v719_v61 = vpop.permute.xlu1 %718  ;;  %v781_v37 = vsub.f32 %v2577_v41, %v724_v29 }
 0x21a   : > { %v780_v8 = vsub.f32 %v2558_v36, %v719_v61 }
 0x21b   : > { %v816_v62 = vmul.f32 1.442695, %v788_v18  ;;  %v1980_v26 = vpop.eup %1979 }
 0x21c   : > { %v800_v53 = vmul.f32 1.442695, %v780_v8  ;;  %824 = vadd.xlane.f32.xlu2 %v1980_v26 }
 0x21d   : > { %1981 = vpow2.f32 %v816_v62  ;;  %v802_v62 = vmul.f32 1.442695, %v781_v37 }
 0x21e   : > { %1983 = vpow2.f32 %v800_v53 }
 0x220   : > { %v764_v13 = vpop.permute.xlu2 %763 }
 0x221   : > { %v739_v3 = vpop.permute.xlu1 %738  ;;  %v789_v36 = vsub.f32 %v2570_v39, %v764_v13 }
 0x222   : > { %v784_v35 = vsub.f32 %v2568_v38, %v739_v3 }
 0x223   : > { %v1982_v16 = vpop.eup %1981  ;;  %v818_v40 = vmul.f32 1.442695, %v789_v36 }
 0x224   : > { %v808_v51 = vmul.f32 1.442695, %v784_v35  ;;  %v1984_v6 = vpop.eup %1983  ;;  %848 = vadd.xlane.f32.xlu0 %v1982_v16 }
 0x225   : > { %832 = vadd.xlane.f32.xlu1 %v1984_v6 }
 0x226   : > { %1985 = vpow2.f32 %v808_v51 }
 0x227   : > { %1987 = vpow2.f32 %v794_v19 }
 0x228   : > { %v749_v61 = vpop.permute.xlu2 %748  ;;  %1989 = vpow2.f32 %v802_v62 }
 0x229   : > { %1991 = vpow2.f32 %v818_v40  ;;  %v786_v38 = vsub.f32 %v2596_v46, %v749_v61 }
 0x22b   : > { %v812_v0 = vmul.f32 1.442695, %v786_v38 }
 0x22c   : > { %v1986_v8 = vpop.eup %1985 }
 0x22d   : > { %v1988_v18 = vpop.eup %1987  ;;  %840 = vadd.xlane.f32.xlu2 %v1986_v8  ;;  %1993 = vpow2.f32 %v812_v0 }
 0x22e   : > { %826 = vadd.xlane.f32.xlu1 %v1988_v18  ;;  %v1990_v26 = vpop.eup %1989 }
 0x22f   : > { %v1992_v41 = vpop.eup %1991 }
 0x230   : > { %v714_v30 = vpop.permute.xlu2 %713 }
 0x231   : > { %v779_v18 = vsub.f32 %v2601_v47, %v714_v30 }
 0x233   : > { %v1994_v19 = vpop.eup %1993  ;;  %v798_v0 = vmul.f32 1.442695, %v779_v18 }
 0x235   : > { %834 = vadd.xlane.f32.xlu2 %v1990_v26 }
 0x236   : > { %850 = vadd.xlane.f32.xlu1 %v1992_v41 }
 0x238   : > { %v744_v29 = vpop.permute.xlu0 %743  ;;  %v734_v53 = vpop.permute.xlu2 %733 }
 0x239   : > { %v785_v59 = vsub.f32 %v2579_v42, %v744_v29  ;;  %v783_v13 = vsub.f32 %v2603_v48, %v734_v53 }
 0x23b   : > { %v810_v3 = vmul.f32 1.442695, %v785_v59  ;;  %v806_v35 = vmul.f32 1.442695, %v783_v13 }
 0x23d   : > { %1995 = vpow2.f32 %v810_v3 }
 0x23e   : > { %1997 = vpow2.f32 %v806_v35  ;;  %844 = vadd.xlane.f32.xlu1 %v1994_v19  ;;  %v3276_v19 = vsub.f32 %v2617_v52, %v2622_v57  ;;  %v676_v52 = vld [vmem:[#allocation3 + $0x60] sm:$0xff] }
 0x240   : > { %v709_v46 = vpop.permute.xlu0 %708 }
 0x241   : > { %v778_v16 = vsub.f32 %v2584_v43, %v709_v46  ;;  %v729_v51 = vpop.permute.xlu1 %728  ;;  %v640_v46 = vmul.f32 1.442695, %v3276_v19 }
 0x242   : > { %v782_v61 = vsub.f32 %v2589_v44, %v729_v51  ;;  %v664_v51 = vld [vmem:[#allocation3] sm:$0xff] }
 0x243   : > { %v1996_v6 = vpop.eup %1995  ;;  %v796_v37 = vmul.f32 1.442695, %v778_v16 }
 0x244   : > { %v1998_v36 = vpop.eup %1997  ;;  %842 = vadd.xlane.f32.xlu0 %v1996_v6  ;;  %v804_v42 = vmul.f32 1.442695, %v782_v61 }
 0x245   : > { %1999 = vpow2.f32 %v796_v37  ;;  %v3278_v37 = vsub.f32 %v2672_v22, %v2678_v28  ;;  %v3280_v22 = vsub.f32 %v2652_v10, %v2658_v15  ;;  %v3281_v10 = vsub.f32 %v2723_v21, %v2728_v33 }
 0x246   : > { %838 = vadd.xlane.f32.xlu1 %v1998_v36  ;;  %2001 = vpow2.f32 %v804_v42  ;;  %v668_v36 = vld [vmem:[#allocation3 + $0x20] sm:$0xff]  ;;  %v3283_v33 = vsub.f32 %v2760_v31, %v2768_v11  ;;  %v671_v11 = vld [vmem:[#allocation3 + $0x38] sm:$0xff] }
 0x247   : > { %v658_v28 = vmul.f32 1.442695, %v3280_v22  ;;  %v652_v15 = vmul.f32 1.442695, %v3281_v10  ;;  %v679_v10 = vld [vmem:[#allocation3 + $0x78] sm:$0xff] }
 0x249   : > { %v769_v48 = vpop.permute.xlu1 %768 }
 0x24a   : > { %v790_v62 = vsub.f32 %v2591_v45, %v769_v48 }
 0x24b   : > { %v2000_v40 = vpop.eup %1999 }
 0x24c   : > { %v820_v8 = vmul.f32 1.442695, %v790_v62  ;;  %828 = vadd.xlane.f32.xlu0 %v2000_v40  ;;  %v2002_v26 = vpop.eup %2001 }
 0x24e   : > { %2003 = vpow2.f32 %v820_v8  ;;  %935 = vadd.xlane.f32.xlu1 %v2610_v50 }
 0x250   : > { %v774_v43 = vpop.permute.xlu0 %773 }
 0x251   : > { %v791_v38 = vsub.f32 %v2610_v50, %v774_v43  ;;  %v754_v41 = vpop.permute.xlu1 %753  ;;  %v3274_v50 = vsub.f32 %v2619_v54, %v2625_v60  ;;  %v3277_v54 = vsub.f32 %v2650_v9, %v2655_v14  ;;  %v3279_v9 = vsub.f32 %v2670_v20, %v2675_v25  ;;  %v672_v43 = vld [vmem:[#allocation3 + $0x40] sm:$0xff] }
 0x252   : > { %v787_v53 = vsub.f32 %v2608_v49, %v754_v41  ;;  %v3275_v49 = vsub.f32 %v2637_v1, %v2640_v7  ;;  %v634_v1 = vmul.f32 1.442695, %v3278_v37  ;;  %v673_v37 = vld [vmem:[#allocation3 + $0x48] sm:$0xff] }
 0x253   : > { %v822_v44 = vmul.f32 1.442695, %v791_v38  ;;  %v632_v3 = vmul.f32 1.442695, %v3274_v50  ;;  %v648_v60 = vmul.f32 1.442695, %v3277_v54 }
 0x254   : > { %v2004_v29 = vpop.eup %2003  ;;  %836 = vadd.xlane.f32.xlu0 %v2002_v26  ;;  %v814_v59 = vmul.f32 1.442695, %v787_v53  ;;  %v656_v35 = vmul.f32 1.442695, %v3275_v49  ;;  %v642_v14 = vmul.f32 1.442695, %v3279_v9  ;;  %v3282_v49 = vsub.f32 %v2704_v2, %v2710_v12 }
 0x255   : > { %2005 = vpow2.f32 %v822_v44  ;;  %852 = vadd.xlane.f32.xlu2 %v2004_v29  ;;  %v3284_v2 = vsub.f32 %v2690_v32, %v2693_v56  ;;  %v3286_v32 = vsub.f32 %v2702_v63, %v2707_v5  ;;  %v3288_v63 = vsub.f32 %v2745_v58, %v2748_v17 }
 0x256   : > { %2007 = vpow2.f32 %v798_v0  ;;  %v665_v0 = vld [vmem:[#allocation3 + $0x8] sm:$0xff]  ;;  %v3289_v58 = vsub.f32 %v2758_v27, %v2765_v4  ;;  %v675_v4 = vld [vmem:[#allocation3 + $0x58] sm:$0xff] }
 0x257   : > { %2009 = vpow2.f32 %v814_v59  ;;  %v669_v59 = vld [vmem:[#allocation3 + $0x28] sm:$0xff]  ;;  %v636_v12 = vmul.f32 1.442695, %v3284_v2  ;;  %v660_v56 = vmul.f32 1.442695, %v3286_v32 }
 0x258   : > { %2011 = vpow2.f32 %v632_v3  ;;  %v638_v5 = vmul.f32 1.442695, %v3288_v63  ;;  %v654_v17 = vmul.f32 1.442695, %v3289_v58 }
 0x259   : > { %2013 = vpow2.f32 %v656_v35  ;;  %v650_v35 = vmul.f32 1.442695, %v3282_v49  ;;  %v903_v49 = vld [vmem:[#allocation4 + $0x70] sm:$0xff] }
 0x25a   : > { %2015 = vpow2.f32 %v640_v46 }
 0x25b   : > { %v2006_v13 = vpop.eup %2005  ;;  %2017 = vpow2.f32 %v648_v60 }
 0x25c   : > { %v2008_v47 = vpop.eup %2007  ;;  %854 = vadd.xlane.f32.xlu0 %v2006_v13  ;;  %2019 = vpow2.f32 %v634_v1 }
 0x25d   : > { %830 = vadd.xlane.f32.xlu2 %v2008_v47  ;;  %v2010_v30 = vpop.eup %2009  ;;  %2021 = vpow2.f32 %v642_v14  ;;  %v677_v47 = vld [vmem:[#allocation3 + $0x68] sm:$0xff] }
 0x25e   : > { %v2012_v16 = vpop.eup %2011  ;;  %2023 = vpow2.f32 %v658_v28 }
 0x25f   : > { %v2014_v7 = vpop.eup %2013  ;;  %2025 = vpow2.f32 %v652_v15 }
 0x260   : > { %v2016_v57 = vpop.eup %2015  ;;  %v692_v61 = vmul.f32 %v2014_v7, %v676_v52  ;;  %2027 = vpow2.f32 %v650_v35 }
 0x261   : > { %v684_v48 = vmul.f32 %v2016_v57, %v668_v36  ;;  %v2018_v18 = vpop.eup %2017  ;;  %v3285_v36 = vsub.f32 %v2725_v23, %v2731_v34  ;;  %v3287_v23 = vsub.f32 %v2762_v55, %v2771_v24 }
 0x262   : > { %v2020_v38 = vpop.eup %2019  ;;  %v688_v26 = vmul.f32 %v2018_v18, %v672_v43 }
 0x263   : > { %v681_v41 = vmul.f32 %v2020_v38, %v665_v0  ;;  %v2022_v53 = vpop.eup %2021  ;;  %v662_v34 = vmul.f32 1.442695, %v3287_v23  ;;  %v670_v38 = vld [vmem:[#allocation3 + $0x30] sm:$0xff] }
 0x264   : > { %933 = vadd.xlane.f32.xlu0 %v2591_v45  ;;  %v680_v45 = vmul.f32 %v2012_v16, %v664_v51  ;;  %v2024_v13 = vpop.eup %2023  ;;  %v646_v16 = vmul.f32 1.442695, %v3283_v33 }
 0x265   : > { %846 = vadd.xlane.f32.xlu2 %v2010_v30  ;;  %v685_v30 = vmul.f32 %v2022_v53, %v669_v59  ;;  %v693_v3 = vmul.f32 %v2024_v13, %v677_v47  ;;  %v2026_v51 = vpop.eup %2025  ;;  %v667_v53 = vld [vmem:[#allocation3 + $0x18] sm:$0xff] }
 0x266   : > { %2029 = vpow2.f32 %v646_v16  ;;  %v2028_v60 = vpop.eup %2027  ;;  %v902_v16 = vld [vmem:[#allocation4 + $0x68] sm:$0xff] }
 0x267   : > { %2031 = vpow2.f32 %v636_v12  ;;  %v689_v1 = vmul.f32 %v2028_v60, %v673_v37 }
 0x26c   : > { %v2030_v31 = vpop.eup %2029 }
 0x26d   : > { %931 = vadd.xlane.f32.xlu2 %v2570_v39  ;;  %v687_v57 = vmul.f32 %v2030_v31, %v671_v11 }
 0x28f   : > { %v825_v6 = vpop.xlane.xlu2 %824 }
 0x290   : > { %v856_v39 = vadd.f32 %v825_v6, %v680_v45  ;;  %v674_v45 = vld [vmem:[#allocation3 + $0x50] sm:$0xff] }
 0x291   : > { %v690_v6 = vmul.f32 %v2026_v51, %v674_v45 }
 0x292   : > { %873 = vst.msk [vmem:[#allocation3] sm:$0xff] %vm872_vm2, %v856_v39 }
 0x297   : > { %v849_v42 = vpop.xlane.xlu0 %848 }
 0x298   : > { %v868_v62 = vadd.f32 %v849_v42, %v692_v61  ;;  %v833_v40 = vpop.xlane.xlu1 %832  ;;  %v644_v61 = vmul.f32 1.442695, %v3285_v36 }
 0x299   : > { %v860_v8 = vadd.f32 %v833_v40, %v684_v48  ;;  %v666_v40 = vld [vmem:[#allocation3 + $0x10] sm:$0xff] }
 0x29a   : > { %885 = vst.msk [vmem:[#allocation3 + $0x60] sm:$0xff] %vm872_vm2, %v868_v62  ;;  %v2032_v62 = vpop.eup %2031  ;;  %2033 = vpow2.f32 %v644_v61 }
 0x29b   : > { %877 = vst.msk [vmem:[#allocation3 + $0x20] sm:$0xff] %vm872_vm2, %v860_v8  ;;  %2035 = vpow2.f32 %v660_v56  ;;  %v682_v9 = vmul.f32 %v2032_v62, %v666_v40  ;;  %v904_v8 = vld [vmem:[#allocation4 + $0x78] sm:$0xff] }
 0x29c   : > { %2037 = vpow2.f32 %v662_v34 }
 0x29d   : > { %2039 = vpow2.f32 %v638_v5 }
 0x29e   : > { %2041 = vpow2.f32 %v654_v17 }
 0x2a0   : > { %v841_v44 = vpop.xlane.xlu2 %840  ;;  %v2034_v43 = vpop.eup %2033 }
 0x2a1   : > { %v864_v20 = vadd.f32 %v841_v44, %v688_v26  ;;  %v827_v25 = vpop.xlane.xlu1 %826  ;;  %v2036_v0 = vpop.eup %2035  ;;  %v678_v26 = vld [vmem:[#allocation3 + $0x70] sm:$0xff]  ;;  %v686_v44 = vmul.f32 %v2034_v43, %v670_v38 }
 0x2a2   : > { %v857_v29 = vadd.f32 %v827_v25, %v681_v41  ;;  %v694_v55 = vmul.f32 %v2036_v0, %v678_v26 }
 0x2a3   : > { %881 = vst.msk [vmem:[#allocation3 + $0x40] sm:$0xff] %vm872_vm2, %v864_v20 }
 0x2a4   : > { %874 = vst.msk [vmem:[#allocation3 + $0x8] sm:$0xff] %vm872_vm2, %v857_v29  ;;  %v2038_v29 = vpop.eup %2037 }
 0x2a5   : > { %v2040_v15 = vpop.eup %2039  ;;  %v695_v59 = vmul.f32 %v2038_v29, %v679_v10 }
 0x2a6   : > { %v683_v47 = vmul.f32 %v2040_v15, %v667_v53  ;;  %v2042_v27 = vpop.eup %2041 }
 0x2a8   : > { %v835_v50 = vpop.xlane.xlu2 %834 }
 0x2a9   : > { %v861_v19 = vadd.f32 %v835_v50, %v685_v30  ;;  %v851_v46 = vpop.xlane.xlu1 %850 }
 0x2aa   : > { %v869_v21 = vadd.f32 %v851_v46, %v693_v3 }
 0x2ab   : > { %878 = vst.msk [vmem:[#allocation3 + $0x28] sm:$0xff] %vm872_vm2, %v861_v19  ;;  %v691_v19 = vmul.f32 %v2042_v27, %v675_v4 }
 0x2ac   : > { %886 = vst.msk [vmem:[#allocation3 + $0x68] sm:$0xff] %vm872_vm2, %v869_v21 }
 0x2b1   : > { %v845_v39 = vpop.xlane.xlu1 %844 }
 0x2b2   : > { %v866_v54 = vadd.f32 %v845_v39, %v690_v6 }
 0x2b4   : > { %883 = vst.msk [vmem:[#allocation3 + $0x50] sm:$0xff] %vm872_vm2, %v866_v54 }
 0x2b7   : > { %v843_v7 = vpop.xlane.xlu0 %842 }
 0x2b8   : > { %v865_v52 = vadd.f32 %v843_v7, %v689_v1 }
 0x2b9   : > { %v839_v42 = vpop.xlane.xlu1 %838 }
 0x2ba   : > { %882 = vst.msk [vmem:[#allocation3 + $0x48] sm:$0xff] %vm872_vm2, %v865_v52  ;;  %v863_v48 = vadd.f32 %v839_v42, %v687_v57 }
 0x2bc   : > { %880 = vst.msk [vmem:[#allocation3 + $0x38] sm:$0xff] %vm872_vm2, %v863_v48 }
 0x2bf   : > { %v829_v14 = vpop.xlane.xlu0 %828 }
 0x2c0   : > { %v858_v22 = vadd.f32 %v829_v14, %v682_v9 }
 0x2c1   : > { %v936_v28 = vpop.xlane.xlu1 %935 }
 0x2c2   : > { %875 = vst.msk [vmem:[#allocation3 + $0x10] sm:$0xff] %vm872_vm2, %v858_v22  ;;  %v952_v18 = vadd.f32 %v936_v28, %v904_v8 }
 0x2c4   : > { %968 = vst.msk [vmem:[#allocation4 + $0x78] sm:$0xff] %vm872_vm2, %v952_v18 }
 0x2c7   : > { %v837_v41 = vpop.xlane.xlu0 %836 }
 0x2c8   : > { %v862_v24 = vadd.f32 %v837_v41, %v686_v44  ;;  %v853_v20 = vpop.xlane.xlu2 %852 }
 0x2c9   : > { %v870_v25 = vadd.f32 %v853_v20, %v694_v55 }
 0x2ca   : > { %879 = vst.msk [vmem:[#allocation3 + $0x30] sm:$0xff] %vm872_vm2, %v862_v24 }
 0x2cb   : > { %887 = vst.msk [vmem:[#allocation3 + $0x70] sm:$0xff] %vm872_vm2, %v870_v25 }
 0x2cf   : > { %v855_v13 = vpop.xlane.xlu0 %854 }
 0x2d0   : > { %v871_v30 = vadd.f32 %v855_v13, %v695_v59  ;;  %v831_v50 = vpop.xlane.xlu2 %830 }
 0x2d1   : > { %v859_v3 = vadd.f32 %v831_v50, %v683_v47 }
 0x2d2   : > { %888 = vst.msk [vmem:[#allocation3 + $0x78] sm:$0xff] %vm872_vm2, %v871_v30 }
 0x2d3   : > { %876 = vst.msk [vmem:[#allocation3 + $0x18] sm:$0xff] %vm872_vm2, %v859_v3 }
 0x2d7   : > { %v934_v35 = vpop.xlane.xlu0 %933 }
 0x2d8   : > { %v951_v46 = vadd.f32 %v934_v35, %v903_v49  ;;  %v847_v21 = vpop.xlane.xlu2 %846 }
 0x2d9   : > { %v867_v33 = vadd.f32 %v847_v21, %v691_v19 }
 0x2da   : > { %967 = vst.msk [vmem:[#allocation4 + $0x70] sm:$0xff] %vm872_vm2, %v951_v46 }
 0x2db   : > { %884 = vst.msk [vmem:[#allocation3 + $0x58] sm:$0xff] %vm872_vm2, %v867_v33 }
 0x2df   : > { %988 = sbr.rel (%p1819_p1) target bundleno = 1177 (0x499), region = 68 }
 0x2e0   : > { %v932_v51 = vpop.xlane.xlu2 %931 }
 0x2e1   : > { %v950_v45 = vadd.f32 %v932_v51, %v902_v16 }
 0x2e3   : > { %966 = vst.msk [vmem:[#allocation4 + $0x68] sm:$0xff] %vm872_vm2, %v950_v45 }
 0x2e4   : > { %v1117_v6 = vld [vmem:[%s3253_s0] sm:$0xff]  ;;  %v1119_v12 = vld [vmem:[%s3253_s0 + $0x10] sm:$0xff]  ;;  %v1118_v31 = vld [vmem:[%s3253_s0 + $0x8] sm:$0xff]  ;;  %vm1612_vm3 = vcmask 0  }
 0x2e5   : > { %v1133_v2 = vld [vmem:[#allocation8] sm:$0xff]  ;;  %v1134_v11 = vld [vmem:[#allocation8 + $0x8] sm:$0xff]  ;;  %v1135_v1 = vld [vmem:[#allocation8 + $0x10] sm:$0xff] }
 0x2e6   : > { %v1149_v39 = vmul.f32 %v1133_v2, %v1117_v6  ;;  %v2886_v54 = vld [vmem:[%s3257_s4] ss:$0 sm:$0xff]  ;;  %v1150_v7 = vmul.f32 %v1134_v11, %v1118_v31  ;;  %v1151_v52 = vmul.f32 %v1135_v1, %v1119_v12  ;;  %v1198_v36 = vld [vmem:[#allocation10 + $0x8] sm:$0xff]  ;;  %v1120_v61 = vld [vmem:[%s3253_s0 + $0x18] sm:$0xff] }
 0x2e7   : > { %v1267_v60 = vmul.f32 %v2886_v54, %v1119_v12  ;;  %v1265_v37 = vmul.f32 %v2886_v54, %v1117_v6  ;;  %v1266_v57 = vmul.f32 %v2886_v54, %v1118_v31  ;;  %v1197_v42 = vld [vmem:[#allocation10] sm:$0xff]  ;;  %v1214_v32 = vmul.f32 %v1198_v36, %v1118_v31  ;;  %v1199_v62 = vld [vmem:[#allocation10 + $0x10] sm:$0xff]  ;;  %v1136_v9 = vld [vmem:[#allocation8 + $0x18] sm:$0xff] }
 0x2e8   : > { %1165 = vadd.xlane.f32.xlu1 %v1149_v39  ;;  %v1268_v56 = vmul.f32 %v2886_v54, %v1120_v61  ;;  %v1213_v48 = vmul.f32 %v1197_v42, %v1117_v6  ;;  %v1121_v40 = vld [vmem:[%s3253_s0 + $0x20] sm:$0xff]  ;;  %v1215_v14 = vmul.f32 %v1199_v62, %v1119_v12  ;;  %v1152_v22 = vmul.f32 %v1136_v9, %v1120_v61  ;;  %v1200_v23 = vld [vmem:[#allocation10 + $0x18] sm:$0xff]  ;;  %v1122_v34 = vld [vmem:[%s3253_s0 + $0x28] sm:$0xff] }
 0x2e9   : > { %1285 = vadd.xlane.f32.xlu2 %v1267_v60  ;;  %1281 = vadd.xlane.f32.xlu0 %v1265_v37  ;;  %v1269_v8 = vmul.f32 %v2886_v54, %v1121_v40  ;;  %v1137_v28 = vld [vmem:[#allocation8 + $0x20] sm:$0xff]  ;;  %v1216_v63 = vmul.f32 %v1200_v23, %v1120_v61  ;;  %v1270_v5 = vmul.f32 %v2886_v54, %v1122_v34  ;;  %v1123_v38 = vld [vmem:[%s3253_s0 + $0x30] sm:$0xff]  ;;  %v1138_v0 = vld [vmem:[#allocation8 + $0x28] sm:$0xff] }
 0x2ea   : > { %v1153_v18 = vmul.f32 %v1137_v28, %v1121_v40  ;;  %v1201_v43 = vld [vmem:[#allocation10 + $0x20] sm:$0xff]  ;;  %v1271_v44 = vmul.f32 %v2886_v54, %v1123_v38  ;;  %v1154_v41 = vmul.f32 %v1138_v0, %v1122_v34  ;;  %v1202_v55 = vld [vmem:[#allocation10 + $0x28] sm:$0xff]  ;;  %v1124_v24 = vld [vmem:[%s3253_s0 + $0x38] sm:$0xff] }
 0x2eb   : > { %v1217_v26 = vmul.f32 %v1201_v43, %v1121_v40  ;;  %v1139_v20 = vld [vmem:[#allocation8 + $0x30] sm:$0xff]  ;;  %v1218_v25 = vmul.f32 %v1202_v55, %v1122_v34  ;;  %v1272_v58 = vmul.f32 %v2886_v54, %v1124_v24  ;;  %v1125_v10 = vld [vmem:[%s3253_s0 + $0x40] sm:$0xff]  ;;  %v1140_v15 = vld [vmem:[#allocation8 + $0x38] sm:$0xff] }
 0x2ec   : > { %v1155_v17 = vmul.f32 %v1139_v20, %v1123_v38  ;;  %v1203_v29 = vld [vmem:[#allocation10 + $0x30] sm:$0xff]  ;;  %v1273_v59 = vmul.f32 %v2886_v54, %v1125_v10  ;;  %v1156_v13 = vmul.f32 %v1140_v15, %v1124_v24  ;;  %v1204_v47 = vld [vmem:[#allocation10 + $0x38] sm:$0xff]  ;;  %v1126_v30 = vld [vmem:[%s3253_s0 + $0x48] sm:$0xff] }
 0x2ed   : > { %v1219_v53 = vmul.f32 %v1203_v29, %v1123_v38  ;;  %v1141_v50 = vld [vmem:[#allocation8 + $0x40] sm:$0xff]  ;;  %v1220_v3 = vmul.f32 %v1204_v47, %v1124_v24  ;;  %v1274_v27 = vmul.f32 %v2886_v54, %v1126_v30  ;;  %v1127_v35 = vld [vmem:[%s3253_s0 + $0x50] sm:$0xff]  ;;  %v1142_v19 = vld [vmem:[#allocation8 + $0x48] sm:$0xff] }
 0x2ee   : > { %v1157_v4 = vmul.f32 %v1141_v50, %v1125_v10  ;;  %v1205_v49 = vld [vmem:[#allocation10 + $0x40] sm:$0xff]  ;;  %v1275_v21 = vmul.f32 %v2886_v54, %v1127_v35  ;;  %v1158_v33 = vmul.f32 %v1142_v19, %v1126_v30  ;;  %v1206_v16 = vld [vmem:[#allocation10 + $0x48] sm:$0xff]  ;;  %v1128_v51 = vld [vmem:[%s3253_s0 + $0x58] sm:$0xff] }
 0x2ef   : > { %v1221_v46 = vmul.f32 %v1205_v49, %v1125_v10  ;;  %v1143_v45 = vld [vmem:[#allocation8 + $0x50] sm:$0xff]  ;;  %v1222_v6 = vmul.f32 %v1206_v16, %v1126_v30  ;;  %v1276_v2 = vmul.f32 %v2886_v54, %v1128_v51  ;;  %v1129_v60 = vld [vmem:[%s3253_s0 + $0x60] sm:$0xff]  ;;  %v1144_v37 = vld [vmem:[#allocation8 + $0x58] sm:$0xff] }
 0x2f0   : > { %1167 = vadd.xlane.f32.xlu1 %v1150_v7  ;;  %v1159_v12 = vmul.f32 %v1143_v45, %v1127_v35  ;;  %v1207_v39 = vld [vmem:[#allocation10 + $0x50] sm:$0xff]  ;;  %v1277_v11 = vmul.f32 %v2886_v54, %v1129_v60  ;;  %v1160_v1 = vmul.f32 %v1144_v37, %v1128_v51  ;;  %v1208_v7 = vld [vmem:[#allocation10 + $0x58] sm:$0xff]  ;;  %v1005_v36 = vld [vmem:[#allocation3] sm:$0xff] }
 0x2f1   : > { %1169 = vadd.xlane.f32.xlu2 %v1151_v52  ;;  %1283 = vadd.xlane.f32.xlu0 %v1266_v57  ;;  %v1223_v31 = vmul.f32 %v1207_v39, %v1127_v35  ;;  %v1130_v52 = vld [vmem:[%s3253_s0 + $0x68] sm:$0xff]  ;;  %v1145_v57 = vld [vmem:[#allocation8 + $0x60] sm:$0xff]  ;;  %v1224_v61 = vmul.f32 %v1208_v7, %v1128_v51  ;;  %2044 = vlog2.f32 %v1005_v36  ;;  %v1131_v62 = vld [vmem:[%s3253_s0 + $0x70] sm:$0xff] }
 0x2f2   : > { %v1278_v42 = vmul.f32 %v2886_v54, %v1130_v52  ;;  %v1146_v40 = vld [vmem:[#allocation8 + $0x68] sm:$0xff]  ;;  %v989_v28 = vld [vmem:[#allocation2] sm:$0xff]  ;;  %v1147_v43 = vld [vmem:[#allocation8 + $0x70] sm:$0xff] }
 0x2f3   : > { %v1162_v23 = vmul.f32 %v1146_v40, %v1130_v52  ;;  %v991_v24 = vld [vmem:[#allocation2 + $0x10] sm:$0xff]  ;;  %v990_v29 = vld [vmem:[#allocation2 + $0x8] sm:$0xff]  ;;  %v1008_v10 = vld [vmem:[#allocation3 + $0x18] sm:$0xff] }
 0x2f4   : > { %v1148_v47 = vld [vmem:[#allocation8 + $0x78] sm:$0xff]  ;;  %v1070_v51 = vld [vmem:[#allocation4 + $0x8] sm:$0xff]  ;;  %v1009_v39 = vld [vmem:[#allocation3 + $0x20] sm:$0xff] }
 0x2f7   : > { %v2045_v9 = vpop.eup %2044 }
 0x2f8   : > { %1231 = vadd.xlane.f32.xlu1 %v1214_v32  ;;  %v1161_v32 = vmul.f32 %v1145_v57, %v1129_v60  ;;  %v1022_v34 = vmul.f32 0.6931472, %v2045_v9 }
 0x2f9   : > { %1287 = vadd.xlane.f32.xlu2 %v1268_v56  ;;  %1229 = vadd.xlane.f32.xlu0 %v1213_v48  ;;  %v1209_v56 = vld [vmem:[#allocation10 + $0x60] sm:$0xff]  ;;  %v1007_v48 = vld [vmem:[#allocation3 + $0x10] sm:$0xff] }
 0x2fa   : > { %2046 = vlog2.f32 %v1007_v48  ;;  %v1053_v38 = vadd.f32 %v1022_v34, %v989_v28  ;;  %v1345_v48 = vld [vmem:[%s3258_s5] sm:$0xff] }
 0x2fb   : > { %v1361_v28 = vsub.f32 1.0, %v1345_v48 }
 0x2fc   : > { %v1085_v20 = vmul.f32 512.0, %v1053_v38 }
 0x300   : > { %1233 = vadd.xlane.f32.xlu1 %v1215_v14  ;;  %v1225_v14 = vmul.f32 %v1209_v56, %v1129_v60  ;;  %v992_v56 = vld [vmem:[#allocation2 + $0x18] sm:$0xff] }
 0x301   : > { %1289 = vadd.xlane.f32.xlu2 %v1269_v8  ;;  %1171 = vadd.xlane.f32.xlu0 %v1152_v22  ;;  %v1006_v8 = vld [vmem:[#allocation3 + $0x8] sm:$0xff]  ;;  %v1279_v22 = vmul.f32 %v2886_v54, %v1131_v62 }
 0x302   : > { %2048 = vlog2.f32 %v1006_v8 }
 0x303   : > { %2050 = vlog2.f32 %v1008_v10 }
 0x304   : > { %2052 = vlog2.f32 %v1009_v39 }
 0x308   : > { %1235 = vadd.xlane.f32.xlu1 %v1216_v63  ;;  %v1210_v63 = vld [vmem:[#allocation10 + $0x68] sm:$0xff] }
 0x309   : > { %1291 = vadd.xlane.f32.xlu2 %v1270_v5  ;;  %1173 = vadd.xlane.f32.xlu0 %v1153_v18  ;;  %v2047_v5 = vpop.eup %2046  ;;  %v1132_v18 = vld [vmem:[%s3253_s0 + $0x78] sm:$0xff]  ;;  %v1226_v0 = vmul.f32 %v1210_v63, %v1130_v52 }
 0x30a   : > { %v1026_v55 = vmul.f32 0.6931472, %v2047_v5  ;;  %v1164_v19 = vmul.f32 %v1148_v47, %v1132_v18 }
 0x30c   : > { %v1055_v15 = vadd.f32 %v1026_v55, %v991_v24 }
 0x310   : > { %1237 = vadd.xlane.f32.xlu1 %v1217_v26  ;;  %v2049_v26 = vpop.eup %2048 }
 0x311   : > { %1293 = vadd.xlane.f32.xlu2 %v1271_v44  ;;  %1175 = vadd.xlane.f32.xlu0 %v1154_v41  ;;  %v1280_v44 = vmul.f32 %v2886_v54, %v1132_v18  ;;  %v1163_v41 = vmul.f32 %v1147_v43, %v1131_v62  ;;  %v2051_v45 = vpop.eup %2050 }
 0x312   : > { %v1028_v57 = vmul.f32 0.6931472, %v2051_v45  ;;  %v2053_v43 = vpop.eup %2052 }
 0x314   : > { %v1056_v34 = vadd.f32 %v1028_v57, %v992_v56  ;;  %v1348_v57 = vld [vmem:[%s3258_s5 + $0x18] sm:$0xff] }
 0x318   : > { %1239 = vadd.xlane.f32.xlu1 %v1218_v25  ;;  %v1069_v25 = vld [vmem:[#allocation4] sm:$0xff] }
 0x319   : > { %1295 = vadd.xlane.f32.xlu2 %v1272_v58  ;;  %1177 = vadd.xlane.f32.xlu0 %v1155_v17  ;;  %v1024_v58 = vmul.f32 0.6931472, %v2049_v26  ;;  %v1211_v17 = vld [vmem:[#allocation10 + $0x70] sm:$0xff] }
 0x31a   : > { %v1227_v30 = vmul.f32 %v1211_v17, %v1131_v62  ;;  %v2958_v62 = vld [vmem:[%s3258_s5 + $0x10] sm:$0xff] }
 0x31b   : > { %v1054_v50 = vadd.f32 %v1024_v58, %v990_v29  ;;  %v1363_v26 = vsub.f32 1.0, %v2958_v62  ;;  %v1364_v62 = vsub.f32 1.0, %v1348_v57 }
 0x31d   : > { %v1086_v16 = vmul.f32 512.0, %v1054_v50 }
 0x320   : > { %1241 = vadd.xlane.f32.xlu1 %v1219_v53 }
 0x321   : > { %1297 = vadd.xlane.f32.xlu2 %v1273_v59  ;;  %1179 = vadd.xlane.f32.xlu0 %v1156_v13  ;;  %v1101_v59 = vsub.f32 %v1069_v25, %v1085_v20  ;;  %v1212_v13 = vld [vmem:[#allocation10 + $0x78] sm:$0xff]  ;;  %v1088_v25 = vmul.f32 512.0, %v1056_v34 }
 0x322   : > { %v1228_v35 = vmul.f32 %v1212_v13, %v1132_v18  ;;  %v1030_v13 = vmul.f32 0.6931472, %v2053_v43 }
 0x328   : > { %1243 = vadd.xlane.f32.xlu1 %v1220_v3 }
 0x329   : > { %1299 = vadd.xlane.f32.xlu2 %v1274_v27  ;;  %1181 = vadd.xlane.f32.xlu0 %v1157_v4  ;;  %v1087_v4 = vmul.f32 512.0, %v1055_v15 }
 0x330   : > { %1245 = vadd.xlane.f32.xlu1 %v1221_v46  ;;  %v1071_v46 = vld [vmem:[#allocation4 + $0x10] sm:$0xff] }
 0x331   : > { %1301 = vadd.xlane.f32.xlu2 %v1275_v21  ;;  %1183 = vadd.xlane.f32.xlu0 %v1158_v33 }
 0x338   : > { %1247 = vadd.xlane.f32.xlu1 %v1222_v6  ;;  %v1103_v6 = vsub.f32 %v1071_v46, %v1087_v4 }
 0x339   : > { %1303 = vadd.xlane.f32.xlu2 %v1276_v2  ;;  %1185 = vadd.xlane.f32.xlu0 %v1159_v12 }
 0x340   : > { %1249 = vadd.xlane.f32.xlu1 %v1223_v31 }
 0x341   : > { %1305 = vadd.xlane.f32.xlu2 %v1277_v11  ;;  %1187 = vadd.xlane.f32.xlu0 %v1160_v1  ;;  %v1102_v1 = vsub.f32 %v1070_v51, %v1086_v16 }
 0x348   : > { %1251 = vadd.xlane.f32.xlu1 %v1224_v61 }
 0x349   : > { %1307 = vadd.xlane.f32.xlu2 %v1278_v42  ;;  %1189 = vadd.xlane.f32.xlu0 %v1161_v32 }
 0x350   : > { %1253 = vadd.xlane.f32.xlu1 %v1225_v14 }
 0x351   : > { %1309 = vadd.xlane.f32.xlu2 %v1279_v22  ;;  %1191 = vadd.xlane.f32.xlu0 %v1162_v23  ;;  %v1346_v22 = vld [vmem:[%s3258_s5 + $0x8] sm:$0xff] }
 0x352   : > { %v1010_v23 = vld [vmem:[#allocation3 + $0x28] sm:$0xff] }
 0x353   : > { %2054 = vlog2.f32 %v1010_v23 }
 0x358   : > { %1255 = vadd.xlane.f32.xlu1 %v1226_v0 }
 0x359   : > { %1311 = vadd.xlane.f32.xlu2 %v1280_v44  ;;  %1193 = vadd.xlane.f32.xlu0 %v1163_v41 }
 0x35b   : > { %v2946_v53 = vpop.xlane.xlu1 %1165 }
 0x35c   : > { %v1313_v54 = vsub.f32 %v2946_v53, %v1053_v38  ;;  %v1286_v3 = vpop.xlane.xlu2 %1285  ;;  %v1282_v27 = vpop.xlane.xlu0 %1281 }
 0x35d   : > { %v1329_v49 = vsub.f32 %v1282_v27, %v1053_v38  ;;  %v1331_v2 = vsub.f32 %v1286_v3, %v1055_v15  ;;  %v1362_v38 = vsub.f32 1.0, %v1346_v22  ;;  %v993_v3 = vld [vmem:[#allocation2 + $0x20] sm:$0xff]  ;;  %v2055_v27 = vpop.eup %2054 }
 0x35e   : > { %v1377_v21 = vmul.f32 0.9, %v1313_v54  ;;  %v1057_v51 = vadd.f32 %v1030_v13, %v993_v3 }
 0x35f   : > { %v1409_v33 = vsub.f32 %v1101_v59, %v1329_v49  ;;  %v1411_v36 = vsub.f32 %v1103_v6, %v1331_v2 }
 0x360   : > { %1257 = vadd.xlane.f32.xlu1 %v1227_v30  ;;  %v1393_v37 = vsub.f32 -0.94852406, %v1377_v21 }
 0x361   : > { %v1425_v12 = vsub.f32 %v1409_v33, %v1313_v54  ;;  %1259 = vadd.xlane.f32.xlu2 %v1228_v35  ;;  %1195 = vadd.xlane.f32.xlu0 %v1164_v19 }
 0x363   : > { %v1168_v60 = vpop.xlane.xlu1 %1167  ;;  %v1441_v31 = vmul.f32 0.00019607843, %v1425_v12 }
 0x364   : > { %v1314_v11 = vsub.f32 %v1168_v60, %v1054_v50  ;;  %v2949_v7 = vpop.xlane.xlu2 %1169  ;;  %v1284_v52 = vpop.xlane.xlu0 %1283 }
 0x365   : > { %v1457_v61 = vsub.f32 %v1393_v37, %v1441_v31  ;;  %v1315_v42 = vsub.f32 %v2949_v7, %v1055_v15  ;;  %v1330_v32 = vsub.f32 %v1284_v52, %v1054_v50  ;;  %v1072_v15 = vld [vmem:[#allocation4 + $0x18] sm:$0xff]  ;;  %v1032_v37 = vmul.f32 0.6931472, %v2055_v27 }
 0x366   : > { %v1378_v40 = vmul.f32 0.9, %v1314_v11  ;;  %v1104_v4 = vsub.f32 %v1072_v15, %v1088_v25 }
 0x367   : > { %v1379_v9 = vmul.f32 0.9, %v1315_v42  ;;  %v1427_v14 = vsub.f32 %v1411_v36, %v1315_v42  ;;  %v1410_v8 = vsub.f32 %v1102_v1, %v1330_v32  ;;  %v1473_v17 = vmul.f32 %v1457_v61, %v1361_v28  ;;  %v994_v42 = vld [vmem:[#allocation2 + $0x28] sm:$0xff] }
 0x368   : > { %v1394_v44 = vsub.f32 -0.94852406, %v1378_v40  ;;  %v1089_v61 = vmul.f32 512.0, %v1057_v51 }
 0x369   : > { %v1395_v63 = vsub.f32 -0.94852406, %v1379_v9  ;;  %v1443_v5 = vmul.f32 0.00019607843, %v1427_v14  ;;  %v1426_v18 = vsub.f32 %v1410_v8, %v1314_v11  ;;  %v1570_v49 = vsel %vm872_vm2, %v1473_v17, 0.0  ;;  %v1349_v17 = vld [vmem:[%s3258_s5 + $0x20] sm:$0xff] }
 0x36a   : > { %v1058_v8 = vadd.f32 %v1032_v37, %v994_v42  ;;  %v1011_v37 = vld [vmem:[#allocation3 + $0x30] sm:$0xff]  ;;  %v1012_v42 = vld [vmem:[#allocation3 + $0x38] sm:$0xff] }
 0x36b   : > { %v1232_v0 = vpop.xlane.xlu1 %1231  ;;  %v1459_v41 = vsub.f32 %v1395_v63, %v1443_v5  ;;  %v1442_v55 = vmul.f32 0.00019607843, %v1426_v18  ;;  %2056 = vlog2.f32 %v1011_v37 }
 0x36c   : > { %v1490_v24 = vsub.f32 %v1168_v60, %v1232_v0  ;;  %v1288_v20 = vpop.xlane.xlu2 %1287  ;;  %v1230_v58 = vpop.xlane.xlu0 %1229  ;;  %2058 = vlog2.f32 %v1012_v42 }
 0x36d   : > { %v1458_v29 = vsub.f32 %v1394_v44, %v1442_v55  ;;  %v1489_v59 = vsub.f32 %v2946_v53, %v1230_v58  ;;  %v1475_v50 = vmul.f32 %v1459_v41, %v1363_v26  ;;  %v1332_v46 = vsub.f32 %v1288_v20, %v1056_v34  ;;  %v1074_v20 = vld [vmem:[#allocation4 + $0x28] sm:$0xff] }
 0x36e   : > { %v1522_v10 = vsub.f32 0.0, %v1490_v24  ;;  %v1090_v41 = vmul.f32 512.0, %v1058_v8 }
 0x36f   : > { %v1474_v47 = vmul.f32 %v1458_v29, %v1362_v38  ;;  %v1521_v30 = vsub.f32 0.0, %v1489_v59  ;;  %v1573_v2 = vsel %vm872_vm2, %v1475_v50, 0.0  ;;  %v1412_v31 = vsub.f32 %v1104_v4, %v1332_v46 }
 0x370   : > { %v1538_v54 = vmax.f32 %v1522_v10, 0.0  ;;  %v1106_v59 = vsub.f32 %v1074_v20, %v1090_v41 }
 0x371   : > { %v1571_v19 = vsel %vm872_vm2, %v1474_v47, 0.0  ;;  %v1537_v21 = vmax.f32 %v1521_v30, 0.0  ;;  %v1365_v30 = vsub.f32 1.0, %v1349_v17 }
 0x372   : > { %v1554_v35 = vmul.f32 %v1538_v54, %v1362_v38  ;;  %v1572_v33 = vadd.f32 %v1571_v19, %v1570_v49 }
 0x373   : > { %v1234_v16 = vpop.xlane.xlu1 %1233  ;;  %v1553_v45 = vmul.f32 %v1537_v21, %v1361_v28 }
 0x374   : > { %v1616_v53 = vsel %vm872_vm2, %v1554_v35, 0.0  ;;  %v1491_v6 = vsub.f32 %v2949_v7, %v1234_v16  ;;  %v1574_v12 = vadd.f32 %v1573_v2, %v1572_v33  ;;  %v1290_v39 = vpop.xlane.xlu2 %1289  ;;  %v1172_v60 = vpop.xlane.xlu0 %1171  ;;  %v1073_v7 = vld [vmem:[#allocation4 + $0x20] sm:$0xff]  ;;  %v2988_v16 = vld [vmem:[%s3258_s5 + $0x28] sm:$0xff] }
 0x375   : > { %v1615_v11 = vsel %vm872_vm2, %v1553_v45, 0.0  ;;  %v1316_v52 = vsub.f32 %v1172_v60, %v1056_v34  ;;  %v1105_v22 = vsub.f32 %v1073_v7, %v1089_v61  ;;  %v1333_v23 = vsub.f32 %v1290_v39, %v1057_v51 }
 0x376   : > { %v1523_v1 = vsub.f32 0.0, %v1491_v6  ;;  %v1617_v36 = vadd.f32 %v1616_v53, %v1615_v11 }
 0x377   : > { %v1380_v56 = vmul.f32 0.9, %v1316_v52  ;;  %v1428_v48 = vsub.f32 %v1412_v31, %v1316_v52  ;;  %v1413_v24 = vsub.f32 %v1105_v22, %v1333_v23 }
 0x378   : > { %v1539_v32 = vmax.f32 %v1523_v1, 0.0 }
 0x379   : > { %v1396_v9 = vsub.f32 -0.94852406, %v1380_v56  ;;  %v1444_v14 = vmul.f32 0.00019607843, %v1428_v48 }
 0x37a   : > { %v1555_v40 = vmul.f32 %v1539_v32, %v1363_v26 }
 0x37b   : > { %v1236_v28 = vpop.xlane.xlu1 %1235  ;;  %v1460_v63 = vsub.f32 %v1396_v9, %v1444_v14 }
 0x37c   : > { %v1618_v34 = vsel %vm872_vm2, %v1555_v40, 0.0  ;;  %v1492_v5 = vsub.f32 %v1172_v60, %v1236_v28  ;;  %v1292_v43 = vpop.xlane.xlu2 %1291  ;;  %v1174_v38 = vpop.xlane.xlu0 %1173  ;;  %v995_v28 = vld [vmem:[#allocation2 + $0x30] sm:$0xff] }
 0x37d   : > { %v1619_v18 = vadd.f32 %v1618_v34, %v1617_v36  ;;  %v1476_v0 = vmul.f32 %v1460_v63, %v1364_v62  ;;  %v1317_v55 = vsub.f32 %v1174_v38, %v1057_v51  ;;  %v1334_v13 = vsub.f32 %v1292_v43, %v1058_v8  ;;  %v2057_v40 = vpop.eup %2056  ;;  %v1014_v43 = vld [vmem:[#allocation3 + $0x48] sm:$0xff] }
 0x37e   : > { %v1524_v44 = vsub.f32 0.0, %v1492_v5  ;;  %v2059_v22 = vpop.eup %2058  ;;  %v1034_v23 = vmul.f32 0.6931472, %v2057_v40 }
 0x37f   : > { %v1575_v25 = vsel %vm872_vm2, %v1476_v0, 0.0  ;;  %v1381_v58 = vmul.f32 0.9, %v1317_v55  ;;  %v1429_v10 = vsub.f32 %v1413_v24, %v1317_v55  ;;  %v1414_v46 = vsub.f32 %v1106_v59, %v1334_v13  ;;  %v1015_v24 = vld [vmem:[#allocation3 + $0x50] sm:$0xff]  ;;  %v1076_v59 = vld [vmem:[#allocation4 + $0x38] sm:$0xff]  ;;  %v1017_v13 = vld [vmem:[#allocation3 + $0x60] sm:$0xff] }
 0x380   : > { %v1540_v26 = vmax.f32 %v1524_v44, 0.0  ;;  %v1576_v29 = vadd.f32 %v1575_v25, %v1574_v12  ;;  %v1366_v12 = vsub.f32 1.0, %v2988_v16  ;;  %v1036_v34 = vmul.f32 0.6931472, %v2059_v22  ;;  %v1016_v25 = vld [vmem:[#allocation3 + $0x58] sm:$0xff] }
 0x381   : > { %v1397_v47 = vsub.f32 -0.94852406, %v1381_v58  ;;  %v1445_v54 = vmul.f32 0.00019607843, %v1429_v10  ;;  %v1059_v5 = vadd.f32 %v1034_v23, %v995_v28  ;;  %v1075_v58 = vld [vmem:[#allocation4 + $0x30] sm:$0xff] }
 0x382   : > { %v1556_v15 = vmul.f32 %v1540_v26, %v1364_v62  ;;  %v1013_v62 = vld [vmem:[#allocation3 + $0x40] sm:$0xff] }
 0x383   : > { %v1238_v50 = vpop.xlane.xlu1 %1237  ;;  %v1461_v49 = vsub.f32 %v1397_v47, %v1445_v54  ;;  %2060 = vlog2.f32 %v1013_v62  ;;  %v1091_v20 = vmul.f32 512.0, %v1059_v5  ;;  %v997_v26 = vld [vmem:[#allocation2 + $0x40] sm:$0xff] }
 0x384   : > { %v1620_v3 = vsel %vm872_vm2, %v1556_v15, 0.0  ;;  %v1493_v27 = vsub.f32 %v1174_v38, %v1238_v50  ;;  %v2980_v35 = vpop.xlane.xlu2 %1293  ;;  %v2982_v19 = vpop.xlane.xlu0 %1175  ;;  %2062 = vlog2.f32 %v1014_v43 }
 0x385   : > { %v1621_v4 = vadd.f32 %v1620_v3, %v1619_v18  ;;  %v1318_v33 = vsub.f32 %v2982_v19, %v1058_v8  ;;  %v1477_v51 = vmul.f32 %v1461_v49, %v1365_v30  ;;  %v996_v18 = vld [vmem:[#allocation2 + $0x38] sm:$0xff]  ;;  %2064 = vlog2.f32 %v1015_v24 }
 0x386   : > { %v1525_v21 = vsub.f32 0.0, %v1493_v27  ;;  %v1060_v0 = vadd.f32 %v1036_v34, %v996_v18  ;;  %2066 = vlog2.f32 %v1016_v25  ;;  %v1107_v10 = vsub.f32 %v1075_v58, %v1091_v20  ;;  %v1078_v25 = vld [vmem:[#allocation4 + $0x48] sm:$0xff] }
 0x387   : > { %v1382_v45 = vmul.f32 0.9, %v1318_v33  ;;  %v1430_v6 = vsub.f32 %v1414_v46, %v1318_v33  ;;  %v1577_v2 = vsel %vm872_vm2, %v1477_v51, 0.0  ;;  %v1335_v15 = vsub.f32 %v2980_v35, %v1059_v5  ;;  %v1077_v35 = vld [vmem:[#allocation4 + $0x40] sm:$0xff] }
 0x388   : > { %v1541_v53 = vmax.f32 %v1525_v21, 0.0  ;;  %v1578_v60 = vadd.f32 %v1577_v2, %v1576_v29  ;;  %v1092_v17 = vmul.f32 512.0, %v1060_v0  ;;  %2068 = vlog2.f32 %v1017_v13  ;;  %v1018_v2 = vld [vmem:[#allocation3 + $0x68] sm:$0xff] }
 0x389   : > { %v1398_v31 = vsub.f32 -0.94852406, %v1382_v45  ;;  %v1446_v11 = vmul.f32 0.00019607843, %v1430_v6  ;;  %v2061_v63 = vpop.eup %2060  ;;  %v1415_v33 = vsub.f32 %v1107_v10, %v1335_v15  ;;  %v998_v6 = vld [vmem:[#allocation2 + $0x48] sm:$0xff]  ;;  %2070 = vlog2.f32 %v1018_v2 }
 0x38a   : > { %v1557_v39 = vmul.f32 %v1541_v53, %v1365_v30  ;;  %v1038_v44 = vmul.f32 0.6931472, %v2061_v63  ;;  %v2063_v47 = vpop.eup %2062  ;;  %v1108_v3 = vsub.f32 %v1076_v59, %v1092_v17  ;;  %v1001_v17 = vld [vmem:[#allocation2 + $0x60] sm:$0xff] }
 0x38b   : > { %v1240_v1 = vpop.xlane.xlu1 %1239  ;;  %v1462_v57 = vsub.f32 %v1398_v31, %v1446_v11  ;;  %v2065_v21 = vpop.eup %2064  ;;  %v1040_v51 = vmul.f32 0.6931472, %v2063_v47  ;;  %v3056_v47 = vld [vmem:[%s3258_s5 + $0x40] sm:$0xff] }
 0x38c   : > { %v1622_v52 = vsel %vm872_vm2, %v1557_v39, 0.0  ;;  %v1296_v61 = vpop.xlane.xlu2 %1295  ;;  %v2995_v32 = vpop.xlane.xlu0 %1177  ;;  %v1061_v29 = vadd.f32 %v1038_v44, %v997_v26  ;;  %v1494_v54 = vsub.f32 %v2982_v19, %v1240_v1  ;;  %v1042_v11 = vmul.f32 0.6931472, %v2065_v21  ;;  %v1019_v1 = vld [vmem:[#allocation3 + $0x70] sm:$0xff]  ;;  %v1352_v44 = vld [vmem:[%s3258_s5 + $0x38] sm:$0xff] }
 0x38d   : > { %v2993_v36 = vadd.f32 %v1622_v52, %v1621_v4  ;;  %v1478_v7 = vmul.f32 %v1462_v57, %v1366_v12  ;;  %v1319_v50 = vsub.f32 %v2995_v32, %v1059_v5  ;;  %v1336_v27 = vsub.f32 %v1296_v61, %v1060_v0  ;;  %v2067_v53 = vpop.eup %2066  ;;  %v999_v61 = vld [vmem:[#allocation2 + $0x50] sm:$0xff]  ;;  %v1000_v5 = vld [vmem:[#allocation2 + $0x58] sm:$0xff] }
 0x38e   : > { %v1093_v4 = vmul.f32 512.0, %v1061_v29  ;;  %v1526_v45 = vsub.f32 0.0, %v1494_v54  ;;  %v3026_v57 = vadd.f32 %v1040_v51, %v998_v6  ;;  %v1044_v42 = vmul.f32 0.6931472, %v2067_v53 }
 0x38f   : > { %v1579_v56 = vsel %vm872_vm2, %v1478_v7, 0.0  ;;  %v1383_v39 = vmul.f32 0.9, %v1319_v50  ;;  %v1416_v37 = vsub.f32 %v1108_v3, %v1336_v27  ;;  %v2069_v7 = vpop.eup %2068  ;;  %2072 = vlog2.f32 %v1019_v1  ;;  %v3064_v27 = vld [vmem:[%s3258_s5 + $0x48] sm:$0xff] }
 0x390   : > { %v3000_v48 = vadd.f32 %v1579_v56, %v1578_v60  ;;  %v1431_v60 = vsub.f32 %v1415_v33, %v1319_v50  ;;  %v1109_v31 = vsub.f32 %v1077_v35, %v1093_v4  ;;  %v1542_v56 = vmax.f32 %v1526_v45, 0.0  ;;  %v1079_v33 = vld [vmem:[#allocation4 + $0x50] sm:$0xff]  ;;  %v1002_v1 = vld [vmem:[#allocation2 + $0x68] sm:$0xff] }
 0x391   : > { %v1399_v28 = vsub.f32 -0.94852406, %v1383_v39  ;;  %v3037_v18 = vadd.f32 %v1042_v11, %v999_v61  ;;  %v3049_v58 = vadd.f32 %v1044_v42, %v1000_v5  ;;  %v1368_v4 = vsub.f32 1.0, %v1352_v44  ;;  %v3082_v11 = vld [vmem:[%s3258_s5 + $0x50] sm:$0xff]  ;;  %v1020_v5 = vld [vmem:[#allocation3 + $0x78] sm:$0xff]  ;;  %v3099_v44 = vld [vmem:[#allocation4 + $0x60] sm:$0xff] }
 0x392   : > { %v1447_v34 = vmul.f32 0.00019607843, %v1431_v60  ;;  %v1558_v10 = vmul.f32 %v1542_v56, %v1366_v12  ;;  %v1369_v53 = vsub.f32 1.0, %v3056_v47  ;;  %2074 = vlog2.f32 %v1020_v5 }
 0x393   : > { %v3002_v9 = vpop.xlane.xlu1 %1241  ;;  %v3059_v3 = vmul.f32 512.0, %v3037_v18  ;;  %v3071_v45 = vmul.f32 512.0, %v3049_v58 }
 0x394   : > { %v3004_v14 = vpop.xlane.xlu2 %1297  ;;  %v3006_v8 = vpop.xlane.xlu0 %1179  ;;  %v1495_v52 = vsub.f32 %v2995_v32, %v3002_v9  ;;  %v1351_v32 = vld [vmem:[%s3258_s5 + $0x30] sm:$0xff]  ;;  %v1463_v15 = vsub.f32 %v1399_v28, %v1447_v34  ;;  %v1624_v2 = vsel %vm872_vm2, %v1558_v10, 0.0 }
 0x395   : > { %v1320_v19 = vsub.f32 %v3006_v8, %v1060_v0  ;;  %v1337_v62 = vsub.f32 %v3004_v14, %v1061_v29  ;;  %v1367_v59 = vsub.f32 1.0, %v1351_v32  ;;  %v1111_v42 = vsub.f32 %v1079_v33, %v3059_v3 }
 0x396   : > { %v1527_v0 = vsub.f32 0.0, %v1495_v52  ;;  %v1625_v32 = vadd.f32 %v1624_v2, %v2993_v36 }
 0x397   : > { %v1384_v40 = vmul.f32 0.9, %v1320_v19  ;;  %v1432_v22 = vsub.f32 %v1416_v37, %v1320_v19  ;;  %v1417_v24 = vsub.f32 %v1109_v31, %v1337_v62  ;;  %v1479_v39 = vmul.f32 %v1463_v15, %v1367_v59  ;;  %v3077_v31 = vld [vmem:[#allocation4 + $0x58] sm:$0xff] }
 0x398   : > { %v1543_v12 = vmax.f32 %v1527_v0, 0.0  ;;  %v1370_v37 = vsub.f32 1.0, %v3064_v27  ;;  %v1112_v0 = vsub.f32 %v3077_v31, %v3071_v45 }
 0x399   : > { %v1400_v20 = vsub.f32 -0.94852406, %v1384_v40  ;;  %v1448_v26 = vmul.f32 0.00019607843, %v1432_v22 }
 0x39a   : > { %v1559_v40 = vmul.f32 %v1543_v12, %v1367_v59 }
 0x39b   : > { %v3008_v38 = vpop.xlane.xlu1 %1243  ;;  %v1464_v51 = vsub.f32 %v1400_v20, %v1448_v26 }
 0x39c   : > { %v3010_v41 = vpop.xlane.xlu2 %1299  ;;  %v3012_v55 = vpop.xlane.xlu0 %1181  ;;  %v1496_v63 = vsub.f32 %v3006_v8, %v3008_v38  ;;  %v3047_v8 = vmul.f32 512.0, %v3026_v57  ;;  %v1046_v38 = vmul.f32 0.6931472, %v2069_v7  ;;  %v1626_v26 = vsel %vm872_vm2, %v1559_v40, 0.0 }
 0x39d   : > { %v1321_v9 = vsub.f32 %v3012_v55, %v1061_v29  ;;  %v2071_v29 = vpop.eup %2070  ;;  %v1338_v22 = vsub.f32 %v3010_v41, %v3026_v57  ;;  %v1581_v41 = vsel %vm872_vm2, %v1479_v39, 0.0  ;;  %v1627_v12 = vadd.f32 %v1626_v26, %v1625_v32 }
 0x39e   : > { %v1528_v13 = vsub.f32 0.0, %v1496_v63  ;;  %v2073_v16 = vpop.eup %2072  ;;  %v1110_v21 = vsub.f32 %v1078_v25, %v3047_v8  ;;  %v3067_v35 = vadd.f32 %v1046_v38, %v1001_v17  ;;  %v1048_v6 = vmul.f32 0.6931472, %v2071_v29  ;;  %v1003_v63 = vld [vmem:[#allocation2 + $0x70] sm:$0xff] }
 0x39f   : > { %v1385_v54 = vmul.f32 0.9, %v1321_v9  ;;  %v1433_v50 = vsub.f32 %v1417_v24, %v1321_v9  ;;  %v1050_v62 = vmul.f32 0.6931472, %v2073_v16  ;;  %v1480_v9 = vmul.f32 %v1464_v51, %v1368_v4  ;;  %v1082_v16 = vld [vmem:[#allocation4 + $0x68] sm:$0xff] }
 0x3a0   : > { %v1544_v60 = vmax.f32 %v1528_v13, 0.0  ;;  %v3094_v34 = vmul.f32 512.0, %v3067_v35  ;;  %v3101_v8 = vadd.f32 %v1048_v6, %v1002_v1  ;;  %v1418_v25 = vsub.f32 %v1110_v21, %v1338_v22 }
 0x3a1   : > { %v1401_v52 = vsub.f32 -0.94852406, %v1385_v54  ;;  %v1449_v61 = vmul.f32 0.00019607843, %v1433_v50  ;;  %v3109_v20 = vadd.f32 %v1050_v62, %v1003_v63  ;;  %v1582_v10 = vadd.f32 %v1581_v41, %v3000_v48 }
 0x3a2   : > { %v1560_v38 = vmul.f32 %v1544_v60, %v1368_v4  ;;  %v1113_v29 = vsub.f32 %v3099_v44, %v3094_v34  ;;  %v1098_v13 = vmul.f32 512.0, %v3101_v8  ;;  %v2075_v60 = vpop.eup %2074 }
 0x3a3   : > { %v3016_v30 = vpop.xlane.xlu1 %1245  ;;  %v1465_v24 = vsub.f32 %v1401_v52, %v1449_v61  ;;  %v3132_v51 = vmul.f32 512.0, %v3109_v20  ;;  %v1052_v44 = vmul.f32 0.6931472, %v2075_v60 }
 0x3a4   : > { %v3019_v49 = vpop.xlane.xlu2 %1301  ;;  %v3021_v46 = vpop.xlane.xlu0 %1183  ;;  %v1497_v28 = vsub.f32 %v3012_v55, %v3016_v30  ;;  %v1371_v30 = vsub.f32 1.0, %v3082_v11  ;;  %v1628_v54 = vsel %vm872_vm2, %v1560_v38, 0.0  ;;  %v1114_v61 = vsub.f32 %v1082_v16, %v1098_v13  ;;  %v1359_v11 = vld [vmem:[%s3258_s5 + $0x70] sm:$0xff] }
 0x3a5   : > { %v1322_v55 = vsub.f32 %v3021_v46, %v3026_v57  ;;  %v1339_v36 = vsub.f32 %v3019_v49, %v3037_v18  ;;  %v1583_v57 = vsel %vm872_vm2, %v1480_v9, 0.0  ;;  %v3121_v49 = vld [vmem:[%s3258_s5 + $0x58] sm:$0xff]  ;;  %v1629_v31 = vadd.f32 %v1628_v54, %v1627_v12 }
 0x3a6   : > { %v1529_v17 = vsub.f32 0.0, %v1497_v28  ;;  %v1584_v45 = vadd.f32 %v1583_v57, %v1582_v10  ;;  %v1372_v39 = vsub.f32 1.0, %v3121_v49 }
 0x3a7   : > { %v1386_v50 = vmul.f32 0.9, %v1322_v55  ;;  %v1434_v3 = vsub.f32 %v1418_v25, %v1322_v55  ;;  %v1419_v4 = vsub.f32 %v1111_v42, %v1339_v36 }
 0x3a8   : > { %v1545_v6 = vmax.f32 %v1529_v17, 0.0 }
 0x3a9   : > { %v1402_v42 = vsub.f32 -0.94852406, %v1386_v50  ;;  %v1450_v62 = vmul.f32 0.00019607843, %v1434_v3 }
 0x3aa   : > { %v1561_v5 = vmul.f32 %v1545_v6, %v1369_v53 }
 0x3ab   : > { %v3029_v23 = vpop.xlane.xlu1 %1247  ;;  %v1466_v36 = vsub.f32 %v1402_v42, %v1450_v62 }
 0x3ac   : > { %v3039_v14 = vpop.xlane.xlu2 %1303  ;;  %v3041_v43 = vpop.xlane.xlu0 %1185  ;;  %v1498_v48 = vsub.f32 %v3021_v46, %v3029_v23  ;;  %v3140_v46 = vld [vmem:[%s3258_s5 + $0x60] sm:$0xff]  ;;  %v3142_v23 = vld [vmem:[#allocation4 + $0x70] sm:$0xff]  ;;  %v1630_v57 = vsel %vm872_vm2, %v1561_v5, 0.0 }
 0x3ad   : > { %v1323_v15 = vsub.f32 %v3041_v43, %v3037_v18  ;;  %v1481_v18 = vmul.f32 %v1465_v24, %v1369_v53  ;;  %v1340_v2 = vsub.f32 %v3039_v14, %v3049_v58  ;;  %v1373_v34 = vsub.f32 1.0, %v3140_v46  ;;  %v1004_v24 = vld [vmem:[#allocation2 + $0x78] sm:$0xff] }
 0x3ae   : > { %v1530_v40 = vsub.f32 0.0, %v1498_v48  ;;  %v1115_v63 = vsub.f32 %v3142_v23, %v3132_v51 }
 0x3af   : > { %v1387_v1 = vmul.f32 0.9, %v1323_v15  ;;  %v1435_v52 = vsub.f32 %v1419_v4, %v1323_v15  ;;  %v1585_v22 = vsel %vm872_vm2, %v1481_v18, 0.0  ;;  %v1420_v32 = vsub.f32 %v1112_v0, %v1340_v2 }
 0x3b0   : > { %v1546_v26 = vmax.f32 %v1530_v40, 0.0  ;;  %v1586_v53 = vadd.f32 %v1585_v22, %v1584_v45 }
 0x3b1   : > { %v1403_v41 = vsub.f32 -0.94852406, %v1387_v1 }
 0x3b3   : > { %v3073_v19 = vpop.xlane.xlu1 %1249 }
 0x3b4   : > { %v3085_v7 = vpop.xlane.xlu2 %1305  ;;  %v3087_v56 = vpop.xlane.xlu0 %1187  ;;  %v1499_v9 = vsub.f32 %v3041_v43, %v3073_v19 }
 0x3b5   : > { %v1324_v14 = vsub.f32 %v3087_v56, %v3049_v58  ;;  %v1341_v28 = vsub.f32 %v3085_v7, %v3067_v35  ;;  %v1451_v58 = vmul.f32 0.00019607843, %v1435_v52 }
 0x3b6   : > { %v1531_v15 = vsub.f32 0.0, %v1499_v9 }
 0x3b7   : > { %v1388_v25 = vmul.f32 0.9, %v1324_v14  ;;  %v1421_v0 = vsub.f32 %v1113_v29, %v1341_v28  ;;  %v1436_v17 = vsub.f32 %v1420_v32, %v1324_v14  ;;  %v1467_v54 = vsub.f32 %v1403_v41, %v1451_v58 }
 0x3b8   : > { %v1482_v29 = vmul.f32 %v1466_v36, %v1370_v37  ;;  %v1547_v51 = vmax.f32 %v1531_v15, 0.0 }
 0x3b9   : > { %v1404_v16 = vsub.f32 -0.94852406, %v1388_v25  ;;  %v1483_v2 = vmul.f32 %v1467_v54, %v1371_v30 }
 0x3ba   : > { %v1563_v32 = vmul.f32 %v1547_v51, %v1371_v30 }
 0x3bb   : > { %v3123_v59 = vpop.xlane.xlu1 %1251 }
 0x3bc   : > { %v1308_v21 = vpop.xlane.xlu2 %1307  ;;  %v1190_v33 = vpop.xlane.xlu0 %1189  ;;  %v1500_v47 = vsub.f32 %v3087_v56, %v3123_v59  ;;  %v3167_v56 = vld [vmem:[%s3258_s5 + $0x68] sm:$0xff]  ;;  %v1562_v59 = vmul.f32 %v1546_v26, %v1370_v37  ;;  %v1587_v37 = vsel %vm872_vm2, %v1482_v29, 0.0 }
 0x3bd   : > { %v1342_v38 = vsub.f32 %v1308_v21, %v3101_v8  ;;  %v1325_v55 = vsub.f32 %v1190_v33, %v3067_v35  ;;  %v3162_v35 = vadd.f32 %v1052_v44, %v1004_v24  ;;  %v1374_v6 = vsub.f32 1.0, %v3167_v56 }
 0x3be   : > { %v1532_v12 = vsub.f32 0.0, %v1500_v47  ;;  %v1632_v52 = vsel %vm872_vm2, %v1562_v59, 0.0  ;;  %v1588_v58 = vadd.f32 %v1587_v37, %v1586_v53  ;;  %v1360_v53 = vld [vmem:[%s3258_s5 + $0x78] sm:$0xff] }
 0x3bf   : > { %v1422_v50 = vsub.f32 %v1114_v61, %v1342_v38  ;;  %v1389_v3 = vmul.f32 0.9, %v1325_v55  ;;  %v1437_v48 = vsub.f32 %v1421_v0, %v1325_v55  ;;  %v1100_v27 = vmul.f32 512.0, %v3162_v35 }
 0x3c0   : > { %v1548_v61 = vmax.f32 %v1532_v12, 0.0  ;;  %v1589_v38 = vsel %vm872_vm2, %v1483_v2, 0.0  ;;  %v1634_v0 = vsel %vm872_vm2, %v1563_v32, 0.0 }
 0x3c1   : > { %v1405_v23 = vsub.f32 -0.94852406, %v1389_v3  ;;  %v1453_v60 = vmul.f32 0.00019607843, %v1437_v48  ;;  %v1376_v3 = vsub.f32 1.0, %v1360_v53 }
 0x3c2   : > { %v1564_v24 = vmul.f32 %v1548_v61, %v1372_v39 }
 0x3c3   : > { %v1254_v7 = vpop.xlane.xlu1 %1253  ;;  %v1469_v55 = vsub.f32 %v1405_v23, %v1453_v60 }
 0x3c4   : > { %v1501_v10 = vsub.f32 %v1190_v33, %v1254_v7  ;;  %v1310_v43 = vpop.xlane.xlu2 %1309  ;;  %v1192_v19 = vpop.xlane.xlu0 %1191  ;;  %v1631_v33 = vadd.f32 %v1630_v57, %v1629_v31  ;;  %v1084_v31 = vld [vmem:[#allocation4 + $0x78] sm:$0xff] }
 0x3c5   : > { %v1326_v13 = vsub.f32 %v1192_v19, %v3101_v8  ;;  %v1452_v8 = vmul.f32 0.00019607843, %v1436_v17  ;;  %v1343_v45 = vsub.f32 %v1310_v43, %v3109_v20  ;;  %v1116_v7 = vsub.f32 %v1084_v31, %v1100_v27 }
 0x3c6   : > { %v1533_v18 = vsub.f32 0.0, %v1501_v10  ;;  %v1633_v30 = vadd.f32 %v1632_v52, %v1631_v33  ;;  %v1485_v57 = vmul.f32 %v1469_v55, %v1373_v34 }
 0x3c7   : > { %v1390_v4 = vmul.f32 0.9, %v1326_v13  ;;  %v1438_v21 = vsub.f32 %v1422_v50, %v1326_v13  ;;  %v1468_v62 = vsub.f32 %v1404_v16, %v1452_v8  ;;  %v1423_v9 = vsub.f32 %v1115_v63, %v1343_v45 }
 0x3c8   : > { %v1549_v40 = vmax.f32 %v1533_v18, 0.0  ;;  %v1636_v13 = vsel %vm872_vm2, %v1564_v24, 0.0  ;;  %v1635_v48 = vadd.f32 %v1634_v0, %v1633_v30 }
 0x3c9   : > { %v1406_v14 = vsub.f32 -0.94852406, %v1390_v4  ;;  %v1454_v22 = vmul.f32 0.00019607843, %v1438_v21  ;;  %v1484_v63 = vmul.f32 %v1468_v62, %v1372_v39  ;;  %v1375_v39 = vsub.f32 1.0, %v1359_v11 }
 0x3ca   : > { %v1637_v4 = vadd.f32 %v1636_v13, %v1635_v48  ;;  %v1593_v21 = vsel %vm872_vm2, %v1485_v57, 0.0 }
 0x3cb   : > { %v1256_v1 = vpop.xlane.xlu1 %1255  ;;  %v1470_v47 = vsub.f32 %v1406_v14, %v1454_v22  ;;  %v1591_v56 = vsel %vm872_vm2, %v1484_v63, 0.0 }
 0x3cc   : > { %v1502_v42 = vsub.f32 %v1192_v19, %v1256_v1  ;;  %v1312_v28 = vpop.xlane.xlu2 %1311  ;;  %v1194_v5 = vpop.xlane.xlu0 %1193  ;;  %v1590_v19 = vadd.f32 %v1589_v38, %v1588_v58 }
 0x3cd   : > { %v1327_v41 = vsub.f32 %v1194_v5, %v3109_v20  ;;  %v1565_v20 = vmul.f32 %v1549_v40, %v1373_v34  ;;  %v1344_v17 = vsub.f32 %v1312_v28, %v3162_v35  ;;  %v1486_v12 = vmul.f32 %v1470_v47, %v1374_v6 }
 0x3ce   : > { %v1534_v44 = vsub.f32 0.0, %v1502_v42  ;;  %v1592_v1 = vadd.f32 %v1591_v56, %v1590_v19 }
 0x3cf   : > { %v1391_v26 = vmul.f32 0.9, %v1327_v41  ;;  %v1439_v25 = vsub.f32 %v1423_v9, %v1327_v41  ;;  %v1638_v29 = vsel %vm872_vm2, %v1565_v20, 0.0  ;;  %v1424_v8 = vsub.f32 %v1116_v7, %v1344_v17 }
 0x3d0   : > { %v1550_v36 = vmax.f32 %v1534_v44, 0.0  ;;  %v1639_v27 = vadd.f32 %v1638_v29, %v1637_v4  ;;  %v1595_v37 = vsel %vm872_vm2, %v1486_v12, 0.0  ;;  %v1594_v31 = vadd.f32 %v1593_v21, %v1592_v1 }
 0x3d1   : > { %v1407_v10 = vsub.f32 -0.94852406, %v1391_v26  ;;  %v1455_v43 = vmul.f32 0.00019607843, %v1439_v25 }
 0x3d2   : > { %v1566_v49 = vmul.f32 %v1550_v36, %v1374_v6 }
 0x3d3   : > { %v1258_v15 = vpop.xlane.xlu1 %1257  ;;  %v1471_v54 = vsub.f32 %v1407_v10, %v1455_v43  ;;  %v1569_v10 = vld [vmem:[#allocation11] sm:$0x1]  ;;  %v1614_v43 = vld [vmem:[#allocation12] sm:$0x1] }
 0x3d4   : > { %v1503_v50 = vsub.f32 %v1194_v5, %v1258_v15  ;;  %v1260_v59 = vpop.xlane.xlu2 %1259  ;;  %v1196_v16 = vpop.xlane.xlu0 %1195  ;;  %v1640_v33 = vsel %vm872_vm2, %v1566_v49, 0.0  ;;  %v1596_v5 = vadd.f32 %v1595_v37, %v1594_v31 }
 0x3d5   : > { %v1328_v46 = vsub.f32 %v1196_v16, %v3162_v35  ;;  %v1504_v34 = vsub.f32 %v1196_v16, %v1260_v59  ;;  %v1487_v51 = vmul.f32 %v1471_v54, %v1375_v39  ;;  %v1641_v35 = vadd.f32 %v1640_v33, %v1639_v27 }
 0x3d6   : > { %v1535_v18 = vsub.f32 0.0, %v1503_v50 }
 0x3d7   : > { %v1392_v2 = vmul.f32 0.9, %v1328_v46  ;;  %v1440_v23 = vsub.f32 %v1424_v8, %v1328_v46  ;;  %v1536_v60 = vsub.f32 0.0, %v1504_v34  ;;  %v1597_v22 = vsel %vm872_vm2, %v1487_v51, 0.0 }
 0x3d8   : > { %v1551_v45 = vmax.f32 %v1535_v18, 0.0  ;;  %v1598_v41 = vadd.f32 %v1597_v22, %v1596_v5 }
 0x3d9   : > { %v1408_v52 = vsub.f32 -0.94852406, %v1392_v2  ;;  %v1456_v61 = vmul.f32 0.00019607843, %v1440_v23  ;;  %v1552_v42 = vmax.f32 %v1536_v60, 0.0 }
 0x3da   : > { %v1567_v6 = vmul.f32 %v1551_v45, %v1375_v39 }
 0x3db   : > { %v1568_v40 = vmul.f32 %v1552_v42, %v1376_v3  ;;  %v1472_v14 = vsub.f32 %v1408_v52, %v1456_v61 }
 0x3dc   : > { %v1642_v62 = vsel %vm872_vm2, %v1567_v6, 0.0 }
 0x3dd   : > { %v1643_v28 = vadd.f32 %v1642_v62, %v1641_v35  ;;  %v1644_v32 = vsel %vm872_vm2, %v1568_v40, 0.0  ;;  %v1488_v9 = vmul.f32 %v1472_v14, %v1376_v3 }
 0x3df   : > { %v1645_v44 = vadd.f32 %v1644_v32, %v1643_v28  ;;  %v1599_v58 = vsel %vm872_vm2, %v1488_v9, 0.0 }
 0x3e0   : > { %v1600_v38 = vadd.f32 %v1599_v58, %v1598_v41 }
 0x3e1   : > { %1646 = vadd.xlane.f32.xlu1 %v1645_v44 }
 0x3e2   : > { %1601 = vadd.xlane.f32.xlu0 %v1600_v38 }
 0x454   : > { %v1647_v55 = vpop.xlane.xlu1 %1646 }
 0x455   : > { %v1648_v7 = vrot.slane %v1647_v55, 4  ;;  %v1602_v24 = vpop.xlane.xlu0 %1601 }
 0x456   : > { %v1603_v26 = vrot.slane %v1602_v24, 4 }
 0x457   : > { %v1649_v36 = vadd.f32 %v1648_v7, %v1647_v55 }
 0x458   : > { %v1604_v11 = vadd.f32 %v1603_v26, %v1602_v24 }
 0x459   : > { %v1650_v25 = vrot.slane %v1649_v36, 2 }
 0x45a   : > { %v1605_v63 = vrot.slane %v1604_v11, 2 }
 0x45b   : > { %v1651_v30 = vadd.f32 %v1650_v25, %v1649_v36 }
 0x45c   : > { %v1606_v20 = vadd.f32 %v1605_v63, %v1604_v11 }
 0x45d   : > { %v1652_v47 = vrot.slane %v1651_v30, 1 }
 0x45e   : > { %v1607_v53 = vrot.slane %v1606_v20, 1 }
 0x45f   : > { %v1653_v0 = vadd.f32 %v1652_v47, %v1651_v30 }
 0x460   : > { %v1608_v17 = vadd.f32 %v1607_v53, %v1606_v20 }
 0x462   : > { %1876 = vpush %v1608_v17 }
 0x463   : > { %1878 = vpush %v1653_v0 }
 0x493   : > { %s1877_s9 = spop %1876 }
 0x494   : > { %v1610_v19 = vstv %s1877_s9  ;;  %s1879_s13 = spop %1878 }
 0x495   : > { %v1611_v57 = vadd.f32 %v1610_v19, %v1569_v10  ;;  %v1655_v49 = vstv %s1879_s13 }
 0x496   : > { %v1656_v39 = vadd.f32 %v1655_v49, %v1614_v43 }
 0x497   : > { %1613 = vst.msk [vmem:[#allocation11] sm:$0x1] %vm1612_vm3, %v1611_v57 }
 0x498   : > { %1657 = vst.msk [vmem:[#allocation12] sm:$0x1] %vm1612_vm3, %v1656_v39 }
 0x499 PF: > { %s3290_s19 = sadd.s32 4294967295, %s2284_s29   ;;  %s1666_s17 = sshll.u32 %s3259_s6, 4  ;;  %s1667_s17 = int_to_ptr.hbm [resolvable:$true] %s1666_s17 }
 0x49a   : > { %p3213_p4 = scmp.eq.s32.totalorder %s3290_s19, 3  ;;  %s2294_s18 = smov [#allocation11]  }
 0x49b   : > { %s1664_s21 = sshll.u32 %s2294_s18, 4  ;;  %s2295_s22 = smov [#allocation12]   ;;  %s1665_s21 = int_to_ptr.vmem [resolvable:$true] %s1664_s21 }
 0x49c   : > { %1891 = dma.vmem_to_hbm [thread:$0]  (%p3213_p4), %s1665_s21, 16, %s1667_s17, [#allocation7]  }
 0x49d   : > { %s1676_s24 = sshll.u32 %s2295_s22, 4  ;;  %s1678_s15 = sshll.u32 %s3260_s7, 4  ;;  %s1677_s24 = int_to_ptr.vmem [resolvable:$true] %s1676_s24  ;;  %s1679_s15 = int_to_ptr.hbm [resolvable:$true] %s1678_s15 }
 0x49e   : > { %1893 = dma.vmem_to_hbm [thread:$0]  (%p3213_p4), %s1677_s24, 16, %s1679_s15, [#allocation13]  }
 0x49f   : > { %2255 = dma.done.wait (%p3213_p4), [#allocation7], 16  }
 0x4a0   : > { %2257 = vsyncadd (%p3213_p4), [#allocation7], 4294967280 }
 0x4a1   : > { %2259 = dma.done.wait (%p3213_p4), [#allocation13], 16  }
 0x4a2   : > { %2261 = vsyncadd (%p3213_p4), [#allocation13], 4294967280 }
 0x4a3 PF: > { %s24_s29 = sadd.s32 1, %s2284_s29   ;;  %s3292_s24 = smov %s2268_s25 }
 0x4a4   : > { %p21_p5 = scmp.ge.s32.totalorder %s24_s29, 6   ;;  %s3293_s25 = smov %s2272_s26 }
 0x4a5   : > { %s3294_s26 = smov %s2417_s16  ;;  %s3295_s27 = smov %s2280_s28 }
 0x4a6   : > { %s3296_s28 = smov %s3298_s23  ;;  %23 = sbr.rel (!%p21_p5) target bundleno = 10 (0xa), region = 117 }
 0x4ab   :  { %1697 = vsyncpa [#allocation6], 1 }
 0x4ac   :  { %1699 = vsyncpa [#allocation6 + $0x1], 1 }
 0x4ad   :  { %1700 = vsyncpa [#allocation9], 1 }
 0x4ae   :  { %1701 = vsyncpa [#allocation7], 1 }
 0x4af   :  { %1703 = vsyncpa [#allocation7 + $0x1], 1 }
 0x4b0   :  { %1704 = vsyncpa [#allocation13], 1 }

</bundles_post_ra>
